<compile_context>
chip_gen: v6e
topology: v6e:2x2x1
jax: 0.10.0
libtpu: 0.0.40
codegen_flags: <defaults>
</compile_context>

<pallas_src>
import math

import jax
import jax.numpy as jnp
from jax.experimental import pallas as pl
from jax.experimental.pallas import tpu as pltpu

_LN_EPS = 1e-5  # torch.nn.LayerNorm default


def _gelu_exact(x):
    # nn.GELU() default is the erf formulation, not the tanh approximation.
    return 0.5 * x * (1.0 + jax.lax.erf(x * (1.0 / math.sqrt(2.0))))


def tokenmix_kernel(xt_ref, g_ref, be_ref, w1t_ref, b1_ref, w2t_ref, b2_ref,
                    w3t_ref, b3_ref, o_ref):
    # xt_ref block: (C, P) = one batch element of x, already in 'b c p' layout.
    y = xt_ref[...]                                            # (C, P) residual

    # LayerNorm over the channel axis C (== nn.LayerNorm(np) applied on 'b p c').
    mu = jnp.mean(y, axis=0, keepdims=True)                    # (1, P)
    var = jnp.mean((y - mu) ** 2, axis=0, keepdims=True)       # (1, P), biased
    yn = (y - mu) * jax.lax.rsqrt(var + _LN_EPS)
    yn = yn * g_ref[...] + be_ref[...]                         # affine, (C,1) cols

    # Token-mixing MLP over the P axis (lane-dense results: N = 512 / 512 / 196).
    h = jnp.dot(yn, w1t_ref[...], preferred_element_type=jnp.float32) + b1_ref[...]
    h = _gelu_exact(h)                                         # (C, 512)
    h = jnp.dot(h, w2t_ref[...], preferred_element_type=jnp.float32) + b2_ref[...]
    h = _gelu_exact(h)                                         # (C, 512)
    z = jnp.dot(h, w3t_ref[...], preferred_element_type=jnp.float32) + b3_ref[...]

    # Residual add, still in 'b c p' layout (wrapper rearranges back).
    o_ref[...] = (y + z).astype(o_ref.dtype)                   # (C, P)


def tokenmix(x, ln_w, ln_b, w1, b1, w2, b2, w3, b3):
    """x: (B, P, C); ln_*: (C,); w1: (H, P); w2: (H, H); w3: (P, H); b*: (out,)."""
    B, P, C = x.shape
    H = w1.shape[0]

    # Layout plumbing mirroring the module's own rearrange: present a
    # lane-dense (C, P) slab per batch element to the kernel.
    xt = jnp.transpose(x, (0, 2, 1))                           # b p c -> b c p

    out_t = pl.pallas_call(
        tokenmix_kernel,
        out_shape=jax.ShapeDtypeStruct((B, C, P), x.dtype),
        grid=(B,),
        in_specs=[
            pl.BlockSpec((None, C, P), lambda b: (b, 0, 0)),   # x (transposed)
            pl.BlockSpec((C, 1), lambda b: (0, 0)),            # LN weight (col)
            pl.BlockSpec((C, 1), lambda b: (0, 0)),            # LN bias (col)
            pl.BlockSpec((P, H), lambda b: (0, 0)),            # net[0].weight.T
            pl.BlockSpec((1, H), lambda b: (0, 0)),            # net[0].bias (row)
            pl.BlockSpec((H, H), lambda b: (0, 0)),            # net[3].weight.T
            pl.BlockSpec((1, H), lambda b: (0, 0)),            # net[3].bias (row)
            pl.BlockSpec((H, P), lambda b: (0, 0)),            # net[6].weight.T
            pl.BlockSpec((1, P), lambda b: (0, 0)),            # net[6].bias (row)
        ],
        out_specs=pl.BlockSpec((None, C, P), lambda b: (b, 0, 0)),
        compiler_params=pltpu.CompilerParams(
            dimension_semantics=("parallel",)),
    )(xt, ln_w.reshape(C, 1), ln_b.reshape(C, 1),
      w1.T, b1.reshape(1, H), w2.T, b2.reshape(1, H), w3.T, b3.reshape(1, P))

    return jnp.transpose(out_t, (0, 2, 1))                     # b c p -> b p c


def tokenmix_ref(x, ln_w, ln_b, w1, b1, w2, b2, w3, b3):
    """Pure-JAX reference with identical semantics (for verification)."""
    mu = jnp.mean(x, axis=-1, keepdims=True)
    var = jnp.mean((x - mu) ** 2, axis=-1, keepdims=True)
    xn = (x - mu) / jnp.sqrt(var + _LN_EPS) * ln_w + ln_b      # LayerNorm(np)
    y = jnp.transpose(xn, (0, 2, 1))                           # (B, C, P)
    h = _gelu_exact(y @ w1.T + b1)
    h = _gelu_exact(h @ w2.T + b2)
    z = h @ w3.T + b3                                          # (B, C, P)
    return x + jnp.transpose(z, (0, 2, 1))


if __name__ == "__main__":
    # Module hardcodes dim=196, hidden_dim=512; np (channels) kept small.
    B, P, C = 2, 196, 16       # batch, tokens (dim), channels (np)
    H = 512                    # hidden_dim

    key = jax.random.PRNGKey(0)
    kx, kg, kb, k1, kb1, k2, kb2, k3, kb3 = jax.random.split(key, 9)

    x = jax.random.normal(kx, (B, P, C), dtype=jnp.float32)

    ln_w = 1.0 + 0.1 * jax.random.normal(kg, (C,), dtype=jnp.float32)
    ln_b = 0.1 * jax.random.normal(kb, (C,), dtype=jnp.float32)

    # PyTorch Linear stores weight as (out_features, in_features).
    w1 = jax.random.normal(k1, (H, P), dtype=jnp.float32) * (1.0 / math.sqrt(P))
    b1 = jax.random.normal(kb1, (H,), dtype=jnp.float32) * 0.05
    w2 = jax.random.normal(k2, (H, H), dtype=jnp.float32) * (1.0 / math.sqrt(H))
    b2 = jax.random.normal(kb2, (H,), dtype=jnp.float32) * 0.05
    w3 = jax.random.normal(k3, (P, H), dtype=jnp.float32) * (1.0 / math.sqrt(H))
    b3 = jax.random.normal(kb3, (P,), dtype=jnp.float32) * 0.05

    out = tokenmix(x, ln_w, ln_b, w1, b1, w2, b2, w3, b3)
    out = jax.block_until_ready(out)

    ref = tokenmix_ref(x, ln_w, ln_b, w1, b1, w2, b2, w3, b3)
    assert out.shape == (B, P, C)
    max_err = jnp.max(jnp.abs(out - ref))
    assert jnp.allclose(out, ref, atol=2e-2, rtol=2e-2), (
        f"mismatch vs reference: max abs err = {max_err:.3e}")

    print("KERNEL_OK")
</pallas_src>

<mosaic_0001>
module attributes {stable_mosaic.version = 11 : i64} {
  func.func @tokenmix_kernel(%arg0: i32, %arg1: memref<1x16x196xf32, #tpu.memory_space<vmem>>, %arg2: memref<16x1xf32, #tpu.memory_space<vmem>>, %arg3: memref<16x1xf32, #tpu.memory_space<vmem>>, %arg4: memref<196x512xf32, #tpu.memory_space<vmem>>, %arg5: memref<1x512xf32, #tpu.memory_space<vmem>>, %arg6: memref<512x512xf32, #tpu.memory_space<vmem>>, %arg7: memref<1x512xf32, #tpu.memory_space<vmem>>, %arg8: memref<512x196xf32, #tpu.memory_space<vmem>>, %arg9: memref<1x196xf32, #tpu.memory_space<vmem>>, %arg10: memref<1x16x196xf32, #tpu.memory_space<vmem>>) attributes {dimension_semantics = [#tpu.dimension_semantics<parallel>], iteration_bounds = array<i64: 2>, scalar_prefetch = 0 : i64, scratch_operands = 0 : i64, tpu.core_type = #tpu.core_type<tc>, window_params = [{transform_indices = @transform_0, window_bounds = array<i64: 1, 16, 196>}, {pipeline_mode = #tpu.pipeline_mode<synchronous>, transform_indices = @transform_1, window_bounds = array<i64: 16, 1>}, {pipeline_mode = #tpu.pipeline_mode<synchronous>, transform_indices = @transform_2, window_bounds = array<i64: 16, 1>}, {pipeline_mode = #tpu.pipeline_mode<synchronous>, transform_indices = @transform_3, window_bounds = array<i64: 196, 512>}, {pipeline_mode = #tpu.pipeline_mode<synchronous>, transform_indices = @transform_4, window_bounds = array<i64: 1, 512>}, {pipeline_mode = #tpu.pipeline_mode<synchronous>, transform_indices = @transform_5, window_bounds = array<i64: 512, 512>}, {pipeline_mode = #tpu.pipeline_mode<synchronous>, transform_indices = @transform_6, window_bounds = array<i64: 1, 512>}, {pipeline_mode = #tpu.pipeline_mode<synchronous>, transform_indices = @transform_7, window_bounds = array<i64: 512, 196>}, {pipeline_mode = #tpu.pipeline_mode<synchronous>, transform_indices = @transform_8, window_bounds = array<i64: 1, 196>}, {transform_indices = @transform_9, window_bounds = array<i64: 1, 16, 196>}]} {
    %c0 = arith.constant 0 : index
    %c0_0 = arith.constant 0 : index
    %c0_1 = arith.constant 0 : index
    %0 = vector.load %arg1[%c0, %c0_0, %c0_1] : memref<1x16x196xf32, #tpu.memory_space<vmem>>, vector<1x16x196xf32>
    %1 = vector.shape_cast %0 : vector<1x16x196xf32> to vector<16x196xf32>
    %cst = arith.constant dense<0.000000e+00> : vector<196xf32>
    %2 = vector.multi_reduction <add>, %1, %cst [0] : vector<16x196xf32> to vector<196xf32>
    %3 = vector.shape_cast %2 : vector<196xf32> to vector<1x196xf32>
    %cst_2 = arith.constant 1.600000e+01 : f32
    %4 = vector.broadcast %cst_2 : f32 to vector<1x196xf32>
    %5 = arith.divf %3, %4 : vector<1x196xf32>
    %6 = vector.broadcast %5 : vector<1x196xf32> to vector<16x196xf32>
    %7 = arith.subf %1, %6 : vector<16x196xf32>
    %8 = arith.mulf %7, %7 : vector<16x196xf32>
    %cst_3 = arith.constant dense<0.000000e+00> : vector<196xf32>
    %9 = vector.multi_reduction <add>, %8, %cst_3 [0] : vector<16x196xf32> to vector<196xf32>
    %10 = vector.shape_cast %9 : vector<196xf32> to vector<1x196xf32>
    %cst_4 = arith.constant 1.600000e+01 : f32
    %11 = vector.broadcast %cst_4 : f32 to vector<1x196xf32>
    %12 = arith.divf %10, %11 : vector<1x196xf32>
    %13 = vector.broadcast %5 : vector<1x196xf32> to vector<16x196xf32>
    %14 = arith.subf %1, %13 : vector<16x196xf32>
    %cst_5 = arith.constant 9.99999974E-6 : f32
    %15 = vector.broadcast %cst_5 : f32 to vector<1x196xf32>
    %16 = arith.addf %12, %15 : vector<1x196xf32>
    %17 = math.rsqrt %16 : vector<1x196xf32>
    %18 = vector.broadcast %17 : vector<1x196xf32> to vector<16x196xf32>
    %19 = arith.mulf %14, %18 : vector<16x196xf32>
    %c0_6 = arith.constant 0 : index
    %c0_7 = arith.constant 0 : index
    %20 = vector.load %arg2[%c0_6, %c0_7] : memref<16x1xf32, #tpu.memory_space<vmem>>, vector<16x1xf32>
    %21 = vector.broadcast %20 : vector<16x1xf32> to vector<16x196xf32>
    %22 = arith.mulf %19, %21 : vector<16x196xf32>
    %c0_8 = arith.constant 0 : index
    %c0_9 = arith.constant 0 : index
    %23 = vector.load %arg3[%c0_8, %c0_9] : memref<16x1xf32, #tpu.memory_space<vmem>>, vector<16x1xf32>
    %24 = vector.broadcast %23 : vector<16x1xf32> to vector<16x196xf32>
    %25 = arith.addf %22, %24 : vector<16x196xf32>
    %c0_10 = arith.constant 0 : index
    %c0_11 = arith.constant 0 : index
    %26 = vector.load %arg4[%c0_10, %c0_11] : memref<196x512xf32, #tpu.memory_space<vmem>>, vector<196x512xf32>
    %cst_12 = arith.constant dense<0.000000e+00> : vector<16x512xf32>
    %27 = tpu.matmul %25, %26, %cst_12 {dimension_numbers = #tpu.dot_dimension_numbers<[1], [0], [0], [1], [0, 0, 1, 1], [], []>} : vector<16x196xf32>, vector<196x512xf32>, vector<16x512xf32> -> vector<16x512xf32>
    %c0_13 = arith.constant 0 : index
    %c0_14 = arith.constant 0 : index
    %28 = vector.load %arg5[%c0_13, %c0_14] : memref<1x512xf32, #tpu.memory_space<vmem>>, vector<1x512xf32>
    %29 = vector.broadcast %28 : vector<1x512xf32> to vector<16x512xf32>
    %30 = arith.addf %27, %29 : vector<16x512xf32>
    %cst_15 = arith.constant 5.000000e-01 : f32
    %31 = vector.broadcast %cst_15 : f32 to vector<16x512xf32>
    %32 = arith.mulf %31, %30 : vector<16x512xf32>
    %cst_16 = arith.constant 0.707106769 : f32
    %33 = vector.broadcast %cst_16 : f32 to vector<16x512xf32>
    %34 = arith.mulf %30, %33 : vector<16x512xf32>
    %35 = math.erf %34 : vector<16x512xf32>
    %cst_17 = arith.constant 1.000000e+00 : f32
    %36 = vector.broadcast %cst_17 : f32 to vector<16x512xf32>
    %37 = arith.addf %36, %35 : vector<16x512xf32>
    %38 = arith.mulf %32, %37 : vector<16x512xf32>
    %c0_18 = arith.constant 0 : index
    %c0_19 = arith.constant 0 : index
    %39 = vector.load %arg6[%c0_18, %c0_19] : memref<512x512xf32, #tpu.memory_space<vmem>>, vector<512x512xf32>
    %cst_20 = arith.constant dense<0.000000e+00> : vector<16x512xf32>
    %40 = tpu.matmul %38, %39, %cst_20 {dimension_numbers = #tpu.dot_dimension_numbers<[1], [0], [0], [1], [0, 0, 1, 1], [], []>} : vector<16x512xf32>, vector<512x512xf32>, vector<16x512xf32> -> vector<16x512xf32>
    %c0_21 = arith.constant 0 : index
    %c0_22 = arith.constant 0 : index
    %41 = vector.load %arg7[%c0_21, %c0_22] : memref<1x512xf32, #tpu.memory_space<vmem>>, vector<1x512xf32>
    %42 = vector.broadcast %41 : vector<1x512xf32> to vector<16x512xf32>
    %43 = arith.addf %40, %42 : vector<16x512xf32>
    %cst_23 = arith.constant 5.000000e-01 : f32
    %44 = vector.broadcast %cst_23 : f32 to vector<16x512xf32>
    %45 = arith.mulf %44, %43 : vector<16x512xf32>
    %cst_24 = arith.constant 0.707106769 : f32
    %46 = vector.broadcast %cst_24 : f32 to vector<16x512xf32>
    %47 = arith.mulf %43, %46 : vector<16x512xf32>
    %48 = math.erf %47 : vector<16x512xf32>
    %cst_25 = arith.constant 1.000000e+00 : f32
    %49 = vector.broadcast %cst_25 : f32 to vector<16x512xf32>
    %50 = arith.addf %49, %48 : vector<16x512xf32>
    %51 = arith.mulf %45, %50 : vector<16x512xf32>
    %c0_26 = arith.constant 0 : index
    %c0_27 = arith.constant 0 : index
    %52 = vector.load %arg8[%c0_26, %c0_27] : memref<512x196xf32, #tpu.memory_space<vmem>>, vector<512x196xf32>
    %cst_28 = arith.constant dense<0.000000e+00> : vector<16x196xf32>
    %53 = tpu.matmul %51, %52, %cst_28 {dimension_numbers = #tpu.dot_dimension_numbers<[1], [0], [0], [1], [0, 0, 1, 1], [], []>} : vector<16x512xf32>, vector<512x196xf32>, vector<16x196xf32> -> vector<16x196xf32>
    %c0_29 = arith.constant 0 : index
    %c0_30 = arith.constant 0 : index
    %54 = vector.load %arg9[%c0_29, %c0_30] : memref<1x196xf32, #tpu.memory_space<vmem>>, vector<1x196xf32>
    %55 = vector.broadcast %54 : vector<1x196xf32> to vector<16x196xf32>
    %56 = arith.addf %53, %55 : vector<16x196xf32>
    %57 = arith.addf %1, %56 : vector<16x196xf32>
    %c0_31 = arith.constant 0 : index
    %c0_32 = arith.constant 0 : index
    %c0_33 = arith.constant 0 : index
    %58 = vector.load %arg10[%c0_31, %c0_32, %c0_33] : memref<1x16x196xf32, #tpu.memory_space<vmem>>, vector<1x16x196xf32>
    %59 = vector.shape_cast %58 : vector<1x16x196xf32> to vector<16x196xf32>
    %60 = vector.shape_cast %57 : vector<16x196xf32> to vector<1x16x196xf32>
    tpu.vector_store %arg10[%c0_31, %c0_32, %c0_33], %60 {strides = array<i32>} : memref<1x16x196xf32, #tpu.memory_space<vmem>>, vector<1x16x196xf32>,
    return
  }
  func.func @transform_0(%arg0: i32) -> (i32, i32, i32) {
    %c0_i32 = arith.constant 0 : i32
    %c0_i32_0 = arith.constant 0 : i32
    %c0_i32_1 = arith.constant 0 : i32
    return %arg0, %c0_i32, %c0_i32_0 : i32, i32, i32
  }
  func.func @transform_1(%arg0: i32) -> (i32, i32) {
    %c0_i32 = arith.constant 0 : i32
    %c0_i32_0 = arith.constant 0 : i32
    %c0_i32_1 = arith.constant 0 : i32
    return %c0_i32, %c0_i32_0 : i32, i32
  }
  func.func @transform_2(%arg0: i32) -> (i32, i32) {
    %c0_i32 = arith.constant 0 : i32
    %c0_i32_0 = arith.constant 0 : i32
    %c0_i32_1 = arith.constant 0 : i32
    return %c0_i32, %c0_i32_0 : i32, i32
  }
  func.func @transform_3(%arg0: i32) -> (i32, i32) {
    %c0_i32 = arith.constant 0 : i32
    %c0_i32_0 = arith.constant 0 : i32
    %c0_i32_1 = arith.constant 0 : i32
    return %c0_i32, %c0_i32_0 : i32, i32
  }
  func.func @transform_4(%arg0: i32) -> (i32, i32) {
    %c0_i32 = arith.constant 0 : i32
    %c0_i32_0 = arith.constant 0 : i32
    %c0_i32_1 = arith.constant 0 : i32
    return %c0_i32, %c0_i32_0 : i32, i32
  }
  func.func @transform_5(%arg0: i32) -> (i32, i32) {
    %c0_i32 = arith.constant 0 : i32
    %c0_i32_0 = arith.constant 0 : i32
    %c0_i32_1 = arith.constant 0 : i32
    return %c0_i32, %c0_i32_0 : i32, i32
  }
  func.func @transform_6(%arg0: i32) -> (i32, i32) {
    %c0_i32 = arith.constant 0 : i32
    %c0_i32_0 = arith.constant 0 : i32
    %c0_i32_1 = arith.constant 0 : i32
    return %c0_i32, %c0_i32_0 : i32, i32
  }
  func.func @transform_7(%arg0: i32) -> (i32, i32) {
    %c0_i32 = arith.constant 0 : i32
    %c0_i32_0 = arith.constant 0 : i32
    %c0_i32_1 = arith.constant 0 : i32
    return %c0_i32, %c0_i32_0 : i32, i32
  }
  func.func @transform_8(%arg0: i32) -> (i32, i32) {
    %c0_i32 = arith.constant 0 : i32
    %c0_i32_0 = arith.constant 0 : i32
    %c0_i32_1 = arith.constant 0 : i32
    return %c0_i32, %c0_i32_0 : i32, i32
  }
  func.func @transform_9(%arg0: i32) -> (i32, i32, i32) {
    %c0_i32 = arith.constant 0 : i32
    %c0_i32_0 = arith.constant 0 : i32
    %c0_i32_1 = arith.constant 0 : i32
    return %arg0, %c0_i32, %c0_i32_0 : i32, i32, i32
  }
}

</mosaic_0001>

<bundles_post_ra>
// kernel: tpu_custom_call.1
= control target key start
LH: loop header
LB: loop body
LE: loop exit
PB: predicated region body
PF: predicated region fallthrough
CT: control target
= control target key end

     0   :  { %14 = vsyncpa [#allocation3], 0  ;;  %s2979_s0 = inlined_call_operand.vmem [shape: f32[2,16,196], index: 0, kind: input, shape index: {}]   ;;  %s2980_s1 = inlined_call_operand.vmem [shape: f32[16,1], index: 1, kind: input, shape index: {}]   ;;  %s2981_s2 = inlined_call_operand.vmem [shape: f32[16,1], index: 2, kind: input, shape index: {}]   ;;  %s2982_s3 = inlined_call_operand.vmem [shape: f32[196,512], index: 3, kind: input, shape index: {}]   ;;  %s2983_s4 = inlined_call_operand.vmem [shape: f32[1,512], index: 4, kind: input, shape index: {}]   ;;  %s2984_s5 = inlined_call_operand.hbm [shape: f32[512,512], index: 5, kind: input, shape index: {}]   ;;  %s2985_s6 = inlined_call_operand.vmem [shape: f32[1,512], index: 6, kind: input, shape index: {}]   ;;  %s2986_s7 = inlined_call_operand.vmem [shape: f32[512,196], index: 7, kind: input, shape index: {}]   ;;  %s2987_s8 = inlined_call_operand.vmem [shape: f32[1,196], index: 8, kind: input, shape index: {}]   ;;  %s2988_s9 = inlined_call_operand.hbm [shape: f32[2,16,196], index: 9, kind: output, shape index: {}]  }
   0x1   :  { %15 = vsyncpa [#allocation4], 0 }
   0x2   :  { %17 = vsyncpa [#allocation4 + $0x1], 0  ;;  %s2057_s30 = smov 0   ;;  %s2059_s10 = smov 0  }
   0x3   :  { %s2061_s11 = smov 0   ;;  %s2063_s12 = smov 0  }
   0x4 LB: > { %s2078_s13 = sadd.s32 4294967295, %s1998_s12   ;;  %s1787_s14 = sadd.s32 4294967294, %s1998_s12   ;;  %s1998_s12 = sphi %s2063_s12, %s2996_s12   ;;  %s1994_s11 = sphi %s2061_s11, %s2995_s11   ;;  %s1990_s10 = sphi %s2059_s10, %s2994_s10   ;;  %s1986_s30 = sphi %s2057_s30, %s2993_s30  }
   0x5   : > { %s2082_s15 = sadd.s32 1, %s1998_s12   ;;  %s224_s16 = sadd.s32 1, %s1994_s11 }
   0x6   : > { %s221_s17 = ssub.s32 %s1998_s12, %s2082_s15  ;;  %p234_p0 = scmp.ne.s32.totalorder %s1994_s11, %s1990_s10 }
   0x7   : > { %p222_p1 = scmp.eq.s32.totalorder %s221_s17, 0  ;;  %p235_p2 = scmp.eq.s32.totalorder %s2078_s13, 1 }
   0x8   : > { %p240_p3 = scmp.ne.s32.totalorder %s1990_s10, %s1986_s30  ;;  %p241_p4 = scmp.eq.s32.totalorder %s1787_s14, 1 }
   0x9   : > { %s2093_s18 = scalar_select %p222_p1, %s1994_s11, %s224_s16  }
   0xa   : > { %p2095_p5 = por %p235_p2, %p234_p0  ;;  %p2099_p6 = por %p241_p4, %p240_p3 }
   0xb   : > { %p1788_p7 = scmp.ge.s32.totalorder %s1998_s12, 1  ;;  %p248_p8 = scmp.lt.s32.totalorder %s1998_s12, 3 }
   0xc   : > { %s2990_s20 = scalar_select %p2099_p6, 1, 0 }
   0xd   : > { %p1825_p9 = scmp.eq.s32.totalorder %s2078_s13, 0  ;;  %p2106_p10 = pnand %p1788_p7, %p248_p8 }
   0xe   : > { %s2000_s22 = smov [#allocation2]  }
   0xf   : > { %s272_s23 = sshll.u32 %s2000_s22, 4  ;;  %p1817_p11 = pneg %p2106_p10  ;;  %s273_s23 = int_to_ptr.vmem [resolvable:$true] %s272_s23 }
  0x10   : > { %s1919_s24 = scalar_lea.vmem %s273_s23, 32768  ;;  %p1927_p3 = scmp.lt.s32.totalorder %s273_s23, %s273_s23 }
  0x11   : > { %p1818_p12 = pnand %p1825_p9, %p1817_p11  ;;  %p1920_p0 = scmp.ne.s32.totalorder %s273_s23, %s1919_s24 }
  0x12   : > { %p1928_p4 = scmp.lt.s32.totalorder %s1919_s24, %s1919_s24 }
  0x13   : > { %p1910_p13 = pneg %p1818_p12 }
  0x14   : > { %p1929_p6 = por %p1928_p4, %p1927_p3 }
  0x15   : > { %p1922_p1 = pnand %p1920_p0, %p1910_p13 }
  0x17   : > { %p1923_p2 = pneg %p1922_p1 }
  0x19   : > { %p1930_p7 = pnand %p1929_p6, %p1923_p2 }
  0x1b   : > { %1933 = shalt.err (!%p1930_p7)
}
  0x1c   : > { %s2001_s25 = smov 512   ;;  %s2002_s26 = smov 32  }
  0x1d   : > { %1820 = dma.hbm_to_vmem [thread:$0]  (!%p1818_p12), %s2984_s5, 32768, %s273_s23, [#allocation3], %s2001_s25, %s2001_s25, %s2002_s26  }
  0x1e   : > { %305 = sbr.rel (%p2106_p10) target bundleno = 891 (0x37b), region = 56 }
  0x23   : > { %1977 = dma.done.wait (%p1825_p9), [#allocation3], 32768  }
  0x24   : > { %1979 = vsyncadd (%p1825_p9), [#allocation3], 4294934528  ;;  %v2003_v0 = vmov 0   ;;  %v404_v1 = vld [vmem:[%s2980_s1] sm:$0xff]  ;;  %v405_v2 = vld [vmem:[%s2980_s1 + $0x8] sm:$0xff]  ;;  %p341_p6 = scmp.lt.s32.totalorder %s2078_s13, 1 }
  0x25   : > { %1866 = vset.pattern.permute.xlu0 %v2003_v0  ;;  %1867 = vset.pattern.permute.xlu1 %v2003_v0  ;;  %v420_v3 = vld [vmem:[%s2981_s2] sm:$0xff]  ;;  %v421_v4 = vld [vmem:[%s2981_s2 + $0x8] sm:$0xff]  ;;  %v499_v6 = vld [vmem:[%s2982_s3 + $0x1f8] sm:$0xff]  ;;  %vm357_vm0 = vcmask 556032   ;;  %vm564_vm1 = vcmask 1043456   ;;  %s338_s22 = sand.u32 1, %s1990_s10  }
  0x26   : > { %408 = vperm.xlu0 %1866, %v404_v1   ;;  %413 = vperm.xlu1 %1867, %v405_v2   ;;  %v497_v5 = vld [vmem:[%s2982_s3 + $0x1e8] sm:$0xff]  ;;  %v496_v7 = vld [vmem:[%s2982_s3 + $0x1e0] sm:$0xff]  ;;  %v498_v8 = vld [vmem:[%s2982_s3 + $0x1f0] sm:$0xff]  ;;  %s2265_s25 = scalar_select %p341_p6, %s2078_s13, 1 }
  0x27   : > { %577 = vmatprep.subr.mxu0 %v497_v5  ;;  %654 = vmatprep.subr.mxu1 %v499_v6  ;;  %v493_v9 = vld [vmem:[%s2982_s3 + $0x1c8] sm:$0xff]  ;;  %v495_v10 = vld [vmem:[%s2982_s3 + $0x1d8] sm:$0xff]  ;;  %v492_v11 = vld [vmem:[%s2982_s3 + $0x1c0] sm:$0xff]  ;;  %s1793_s21 = sshll.u32 %s338_s22, 5  ;;  %s1810_s27 = sshll.u32 %s2078_s13, 9 }
  0x28   : > { %578 = vmatpush1.msra.mxu0 %v496_v7  ;;  %655 = vmatpush1.msra.mxu1 %v498_v8  ;;  %v494_v12 = vld [vmem:[%s2982_s3 + $0x1d0] sm:$0xff]  ;;  %v489_v13 = vld [vmem:[%s2982_s3 + $0x1a8] sm:$0xff]  ;;  %v491_v14 = vld [vmem:[%s2982_s3 + $0x1b8] sm:$0xff]  ;;  %s1809_s16 = sshll.u32 %s2265_s25, 5  ;;  %s340_s24 = scalar_lea.vmem [#allocation5], %s1793_s21 }
  0x29   : > { %579 = vmatprep.subr.mxu0 %v493_v9  ;;  %656 = vmatprep.subr.mxu1 %v495_v10  ;;  %v488_v15 = vld [vmem:[%s2982_s3 + $0x1a0] sm:$0xff]  ;;  %v490_v16 = vld [vmem:[%s2982_s3 + $0x1b0] sm:$0xff]  ;;  %v485_v17 = vld [vmem:[%s2982_s3 + $0x188] sm:$0xff]  ;;  %s2313_s23 = scalar_lea.vmem %s2979_s0, %s1809_s16  ;;  %s1713_s26 = sshll.u32 %s340_s24, 4  ;;  %s2928_s26 = int_to_ptr.vmem [resolvable:$true] %s1713_s26 }
  0x2a   : > { %424 = vperm.xlu0 %1866, %v420_v3   ;;  %429 = vperm.xlu1 %1867, %v421_v4   ;;  %v487_v18 = vld [vmem:[%s2982_s3 + $0x198] sm:$0xff]  ;;  %v484_v19 = vld [vmem:[%s2982_s3 + $0x180] sm:$0xff]  ;;  %v486_v20 = vld [vmem:[%s2982_s3 + $0x190] sm:$0xff]  ;;  %s2933_s29 = scalar_lea.hbm %s2988_s9, %s1810_s27  ;;  %s2939_s13 = scalar_lea.sflag [#allocation4], %s338_s22 }
  0x2b   : > { %580 = vmatpush1.msra.mxu0 %v492_v11  ;;  %657 = vmatpush1.msra.mxu1 %v494_v12  ;;  %v481_v21 = vld [vmem:[%s2982_s3 + $0x168] sm:$0xff]  ;;  %v483_v22 = vld [vmem:[%s2982_s3 + $0x178] sm:$0xff]  ;;  %v480_v23 = vld [vmem:[%s2982_s3 + $0x160] sm:$0xff]  ;;  %s1934_s16 = scalar_lea.vmem %s2928_s26, 512  ;;  %s2004_s14 = smov [#allocation5]  }
  0x2c   : > { %581 = vmatprep.subr.mxu0 %v489_v13  ;;  %658 = vmatprep.subr.mxu1 %v491_v14  ;;  %v482_v24 = vld [vmem:[%s2982_s3 + $0x170] sm:$0xff]  ;;  %v477_v25 = vld [vmem:[%s2982_s3 + $0x148] sm:$0xff]  ;;  %v479_v26 = vld [vmem:[%s2982_s3 + $0x158] sm:$0xff]  ;;  %p1935_p8 = scmp.ne.s32.totalorder %s2928_s26, %s1934_s16  ;;  %s1938_s17 = sshll.u32 %s2004_s14, 4  ;;  %s1939_s17 = int_to_ptr.vmem [resolvable:$false] %s1938_s17 }
  0x2d   : > { %582 = vmatpush1.msra.mxu0 %v488_v15  ;;  %659 = vmatpush1.msra.mxu1 %v490_v16  ;;  %v476_v27 = vld [vmem:[%s2982_s3 + $0x140] sm:$0xff]  ;;  %v478_v28 = vld [vmem:[%s2982_s3 + $0x150] sm:$0xff]  ;;  %v473_v29 = vld [vmem:[%s2982_s3 + $0x128] sm:$0xff]  ;;  %s1940_s21 = scalar_lea.vmem %s1939_s17, 1024  ;;  %p1941_p11 = scmp.lt.s32.totalorder %s2928_s26, %s1939_s17 }
  0x2e   : > { %583 = vmatprep.subr.mxu0 %v485_v17  ;;  %660 = vmatprep.subr.mxu1 %v487_v18  ;;  %v475_v30 = vld [vmem:[%s2982_s3 + $0x138] sm:$0xff]  ;;  %v472_v31 = vld [vmem:[%s2982_s3 + $0x120] sm:$0xff]  ;;  %v474_v32 = vld [vmem:[%s2982_s3 + $0x130] sm:$0xff]  ;;  %p1936_p9 = pnand %p1935_p8, %p2095_p5  ;;  %p1942_p12 = scmp.lt.s32.totalorder %s1940_s21, %s1934_s16 }
  0x2f   : > { %584 = vmatpush1.msra.mxu0 %v484_v19  ;;  %661 = vmatpush1.msra.mxu1 %v486_v20  ;;  %v469_v33 = vld [vmem:[%s2982_s3 + $0x108] sm:$0xff]  ;;  %v471_v34 = vld [vmem:[%s2982_s3 + $0x118] sm:$0xff]  ;;  %v468_v35 = vld [vmem:[%s2982_s3 + $0x100] sm:$0xff] }
  0x30   : > { %585 = vmatprep.subr.mxu0 %v481_v21  ;;  %662 = vmatprep.subr.mxu1 %v483_v22  ;;  %v470_v36 = vld [vmem:[%s2982_s3 + $0x110] sm:$0xff]  ;;  %v465_v37 = vld [vmem:[%s2982_s3 + $0xe8] sm:$0xff]  ;;  %v467_v38 = vld [vmem:[%s2982_s3 + $0xf8] sm:$0xff]  ;;  %p1937_p10 = pneg %p1936_p9  ;;  %p1943_p13 = por %p1942_p12, %p1941_p11 }
  0x31   : > { %586 = vmatpush1.msra.mxu0 %v480_v23  ;;  %663 = vmatpush1.msra.mxu1 %v482_v24  ;;  %v464_v39 = vld [vmem:[%s2982_s3 + $0xe0] sm:$0xff]  ;;  %v466_v40 = vld [vmem:[%s2982_s3 + $0xf0] sm:$0xff]  ;;  %v461_v41 = vld [vmem:[%s2982_s3 + $0xc8] sm:$0xff] }
  0x32   : > { %587 = vmatprep.subr.mxu0 %v477_v25  ;;  %664 = vmatprep.subr.mxu1 %v479_v26  ;;  %v463_v42 = vld [vmem:[%s2982_s3 + $0xd8] sm:$0xff]  ;;  %v460_v43 = vld [vmem:[%s2982_s3 + $0xc0] sm:$0xff]  ;;  %v462_v44 = vld [vmem:[%s2982_s3 + $0xd0] sm:$0xff]  ;;  %p1944_p0 = pnand %p1943_p13, %p1937_p10 }
  0x33   : > { %588 = vmatpush1.msra.mxu0 %v476_v27  ;;  %665 = vmatpush1.msra.mxu1 %v478_v28  ;;  %v457_v45 = vld [vmem:[%s2982_s3 + $0xa8] sm:$0xff]  ;;  %v459_v46 = vld [vmem:[%s2982_s3 + $0xb8] sm:$0xff]  ;;  %v456_v47 = vld [vmem:[%s2982_s3 + $0xa0] sm:$0xff] }
  0x34   : > { %589 = vmatprep.subr.mxu0 %v473_v29  ;;  %666 = vmatprep.subr.mxu1 %v475_v30  ;;  %v458_v48 = vld [vmem:[%s2982_s3 + $0xb0] sm:$0xff]  ;;  %v453_v49 = vld [vmem:[%s2982_s3 + $0x88] sm:$0xff]  ;;  %v455_v50 = vld [vmem:[%s2982_s3 + $0x98] sm:$0xff] }
  0x35   : > { %590 = vmatpush1.msra.mxu0 %v472_v31  ;;  %667 = vmatpush1.msra.mxu1 %v474_v32  ;;  %v452_v51 = vld [vmem:[%s2982_s3 + $0x80] sm:$0xff]  ;;  %v454_v52 = vld [vmem:[%s2982_s3 + $0x90] sm:$0xff]  ;;  %v449_v53 = vld [vmem:[%s2982_s3 + $0x68] sm:$0xff] }
  0x36   : > { %591 = vmatprep.subr.mxu0 %v469_v33  ;;  %668 = vmatprep.subr.mxu1 %v471_v34  ;;  %v451_v54 = vld [vmem:[%s2982_s3 + $0x78] sm:$0xff]  ;;  %v448_v55 = vld [vmem:[%s2982_s3 + $0x60] sm:$0xff]  ;;  %v450_v56 = vld [vmem:[%s2982_s3 + $0x70] sm:$0xff] }
  0x37   : > { %592 = vmatpush1.msra.mxu0 %v468_v35  ;;  %669 = vmatpush1.msra.mxu1 %v470_v36  ;;  %v445_v57 = vld [vmem:[%s2982_s3 + $0x48] sm:$0xff]  ;;  %v447_v58 = vld [vmem:[%s2982_s3 + $0x58] sm:$0xff]  ;;  %v444_v59 = vld [vmem:[%s2982_s3 + $0x40] sm:$0xff] }
  0x38   : > { %593 = vmatprep.subr.mxu0 %v465_v37  ;;  %670 = vmatprep.subr.mxu1 %v467_v38  ;;  %v446_v60 = vld [vmem:[%s2982_s3 + $0x50] sm:$0xff]  ;;  %v441_v61 = vld [vmem:[%s2982_s3 + $0x28] sm:$0xff]  ;;  %v443_v62 = vld [vmem:[%s2982_s3 + $0x38] sm:$0xff] }
  0x39   : > { %594 = vmatpush1.msra.mxu0 %v464_v39  ;;  %671 = vmatpush1.msra.mxu1 %v466_v40  ;;  %v440_v63 = vld [vmem:[%s2982_s3 + $0x20] sm:$0xff]  ;;  %v442_v0 = vld [vmem:[%s2982_s3 + $0x30] sm:$0xff]  ;;  %v437_v1 = vld [vmem:[%s2982_s3 + $0x8] sm:$0xff] }
  0x3a   : > { %595 = vmatprep.subr.mxu0 %v461_v41  ;;  %672 = vmatprep.subr.mxu1 %v463_v42  ;;  %v439_v2 = vld [vmem:[%s2982_s3 + $0x18] sm:$0xff]  ;;  %v2334_v3 = vld [vmem:[%s2313_s23] sm:$0xff]  ;;  %v2337_v4 = vld [vmem:[%s2313_s23 + $0x8] sm:$0xff] }
  0x3b   : > { %596 = vmatpush1.msra.mxu0 %v460_v43  ;;  %673 = vmatpush1.msra.mxu1 %v462_v44  ;;  %v2340_v5 = vld [vmem:[%s2313_s23 + $0x10] sm:$0xff]  ;;  %v436_v6 = vld [vmem:[%s2982_s3] sm:$0xff]  ;;  %v2349_v8 = vld [vmem:[%s2313_s23 + $0x18] sm:$0xff]  ;;  %v358_v10 = vsel %vm357_vm0, %v2337_v4, 0.0 }
  0x3c   : > { %597 = vmatprep.subr.mxu0 %v457_v45  ;;  %674 = vmatprep.subr.mxu1 %v459_v46  ;;  %v438_v7 = vld [vmem:[%s2982_s3 + $0x10] sm:$0xff]  ;;  %v350_v9 = vadd.f32 %v2340_v5, %v2334_v3  ;;  %v533_v11 = vld [vmem:[%s2982_s3 + $0x308] sm:$0xf]  ;;  %v535_v12 = vld [vmem:[%s2982_s3 + $0x318] sm:$0xf]  ;;  %v359_v13 = vsel %vm357_vm0, %v2349_v8, 0.0 }
  0x3d   : > { %598 = vmatpush1.msra.mxu0 %v456_v47  ;;  %675 = vmatpush1.msra.mxu1 %v458_v48  ;;  %v532_v14 = vld [vmem:[%s2982_s3 + $0x300] sm:$0xf]  ;;  %v534_v15 = vld [vmem:[%s2982_s3 + $0x310] sm:$0xf]  ;;  %v360_v16 = vadd.f32 %v359_v13, %v358_v10  ;;  %v529_v17 = vld [vmem:[%s2982_s3 + $0x2e8] sm:$0xff] }
  0x3e   : > { %599 = vmatprep.subr.mxu0 %v453_v49  ;;  %676 = vmatprep.subr.mxu1 %v455_v50  ;;  %v531_v18 = vld [vmem:[%s2982_s3 + $0x2f8] sm:$0xff]  ;;  %v351_v19 = vrot.slane %v350_v9, 4  ;;  %v528_v20 = vld [vmem:[%s2982_s3 + $0x2e0] sm:$0xff]  ;;  %v530_v21 = vld [vmem:[%s2982_s3 + $0x2f0] sm:$0xff] }
  0x3f   : > { %600 = vmatpush1.msra.mxu0 %v452_v51  ;;  %677 = vmatpush1.msra.mxu1 %v454_v52  ;;  %v361_v22 = vrot.slane %v360_v16, 4  ;;  %v525_v23 = vld [vmem:[%s2982_s3 + $0x2c8] sm:$0xff]  ;;  %v527_v24 = vld [vmem:[%s2982_s3 + $0x2d8] sm:$0xff]  ;;  %v524_v25 = vld [vmem:[%s2982_s3 + $0x2c0] sm:$0xff] }
  0x40   : > { %601 = vmatprep.subr.mxu0 %v449_v53  ;;  %678 = vmatprep.subr.mxu1 %v451_v54  ;;  %v526_v26 = vld [vmem:[%s2982_s3 + $0x2d0] sm:$0xff]  ;;  %v521_v28 = vld [vmem:[%s2982_s3 + $0x2a8] sm:$0xff]  ;;  %v523_v29 = vld [vmem:[%s2982_s3 + $0x2b8] sm:$0xff]  ;;  %v352_v30 = vadd.f32 %v351_v19, %v350_v9 }
  0x41   : > { %602 = vmatpush1.msra.mxu0 %v448_v55  ;;  %679 = vmatpush1.msra.mxu1 %v450_v56  ;;  %v362_v27 = vadd.f32 %v361_v22, %v360_v16  ;;  %v520_v31 = vld [vmem:[%s2982_s3 + $0x2a0] sm:$0xff]  ;;  %v522_v32 = vld [vmem:[%s2982_s3 + $0x2b0] sm:$0xff]  ;;  %v517_v33 = vld [vmem:[%s2982_s3 + $0x288] sm:$0xff] }
  0x42   : > { %603 = vmatprep.subr.mxu0 %v445_v57  ;;  %680 = vmatprep.subr.mxu1 %v447_v58  ;;  %v519_v34 = vld [vmem:[%s2982_s3 + $0x298] sm:$0xff]  ;;  %v516_v36 = vld [vmem:[%s2982_s3 + $0x280] sm:$0xff]  ;;  %v518_v37 = vld [vmem:[%s2982_s3 + $0x290] sm:$0xff]  ;;  %v353_v40 = vrot.slane %v352_v30, 2 }
  0x43   : > { %604 = vmatpush1.msra.mxu0 %v444_v59  ;;  %681 = vmatpush1.msra.mxu1 %v446_v60  ;;  %v363_v35 = vrot.slane %v362_v27, 2  ;;  %v513_v38 = vld [vmem:[%s2982_s3 + $0x268] sm:$0xff]  ;;  %v515_v39 = vld [vmem:[%s2982_s3 + $0x278] sm:$0xff]  ;;  %v512_v41 = vld [vmem:[%s2982_s3 + $0x260] sm:$0xff] }
  0x44   : > { %605 = vmatprep.subr.mxu0 %v441_v61  ;;  %682 = vmatprep.subr.mxu1 %v443_v62  ;;  %v514_v42 = vld [vmem:[%s2982_s3 + $0x270] sm:$0xff]  ;;  %v509_v44 = vld [vmem:[%s2982_s3 + $0x248] sm:$0xff]  ;;  %v511_v45 = vld [vmem:[%s2982_s3 + $0x258] sm:$0xff]  ;;  %v354_v48 = vadd.f32 %v353_v40, %v352_v30 }
  0x45   : > { %606 = vmatpush1.msra.mxu0 %v440_v63  ;;  %683 = vmatpush1.msra.mxu1 %v442_v0  ;;  %v364_v43 = vadd.f32 %v363_v35, %v362_v27  ;;  %v508_v46 = vld [vmem:[%s2982_s3 + $0x240] sm:$0xff]  ;;  %v510_v47 = vld [vmem:[%s2982_s3 + $0x250] sm:$0xff]  ;;  %v505_v49 = vld [vmem:[%s2982_s3 + $0x228] sm:$0xff] }
  0x46   : > { %607 = vmatprep.subr.mxu0 %v437_v1  ;;  %684 = vmatprep.subr.mxu1 %v439_v2  ;;  %v507_v50 = vld [vmem:[%s2982_s3 + $0x238] sm:$0xff]  ;;  %v504_v51 = vld [vmem:[%s2982_s3 + $0x220] sm:$0xff]  ;;  %v506_v53 = vld [vmem:[%s2982_s3 + $0x230] sm:$0xff]  ;;  %v355_v57 = vrot.slane %v354_v48, 1 }
  0x47   : > { %608 = vmatpush1.msra.mxu0 %v436_v6  ;;  %685 = vmatpush1.msra.mxu1 %v438_v7  ;;  %v365_v52 = vrot.slane %v364_v43, 1  ;;  %v501_v54 = vld [vmem:[%s2982_s3 + $0x208] sm:$0xff]  ;;  %v503_v55 = vld [vmem:[%s2982_s3 + $0x218] sm:$0xff]  ;;  %v500_v56 = vld [vmem:[%s2982_s3 + $0x200] sm:$0xff] }
  0x48   : > { %1796 = vmatprep.subr.msk.mxu0 %vm564_vm1, %v533_v11  ;;  %1800 = vmatprep.subr.msk.mxu1 %vm564_vm1, %v535_v12  ;;  %v502_v58 = vld [vmem:[%s2982_s3 + $0x210] sm:$0xff]  ;;  %v832_v59 = vld [vmem:[#allocation2 + $0x1e8] sm:$0xff]  ;;  %v356_v62 = vadd.f32 %v355_v57, %v354_v48 }
  0x49   : > { %1797 = vmatpush2.msk.msra.mxu0 %vm564_vm1, %v532_v14  ;;  %1801 = vmatpush2.msk.msra.mxu1 %vm564_vm1, %v534_v15  ;;  %v960_v60 = vld [vmem:[#allocation2 + $0x5e8] sm:$0xff]  ;;  %v366_v61 = vadd.f32 %v365_v52, %v364_v43  ;;  %v955_v52 = vld [vmem:[#allocation2 + $0x5c0] sm:$0xff] }
  0x4a   : > { %625 = vmatprep.subr.mxu0 %v529_v17  ;;  %702 = vmatprep.subr.mxu1 %v531_v18  ;;  %v368_v0 = vmul.f32 0.0625, %v356_v62  ;;  %v820_v57 = vld [vmem:[#allocation2 + $0x188] sm:$0xff] }
  0x4b   : > { %626 = vmatpush2.msra.mxu0 %v528_v20  ;;  %703 = vmatpush2.msra.mxu1 %v530_v21  ;;  %v369_v63 = vmul.f32 0.0625, %v366_v61  ;;  %v816_v61 = vld [vmem:[#allocation2 + $0x168] sm:$0xff] }
  0x4c   : > { %627 = vmatprep.subr.mxu0 %v525_v23  ;;  %704 = vmatprep.subr.mxu1 %v527_v24  ;;  %v370_v6 = vsub.f32 %v2334_v3, %v368_v0  ;;  %v372_v7 = vsub.f32 %v2340_v5, %v368_v0  ;;  %v944_v62 = vld [vmem:[#allocation2 + $0x568] sm:$0xff]  ;;  %v943_v0 = vld [vmem:[#allocation2 + $0x560] sm:$0xff] }
  0x4d   : > { %628 = vmatpush2.msra.mxu0 %v524_v25  ;;  %705 = vmatpush2.msra.mxu1 %v526_v26  ;;  %v371_v1 = vsub.f32 %v2337_v4, %v369_v63  ;;  %v373_v2 = vsub.f32 %v2349_v8, %v369_v63  ;;  %v815_v63 = vld [vmem:[#allocation2 + $0x160] sm:$0xff] }
  0x4e   : > { %629 = vmatprep.subr.mxu0 %v521_v28  ;;  %706 = vmatprep.subr.mxu1 %v523_v29  ;;  %v374_v11 = vmul.f32 %v370_v6, %v370_v6  ;;  %v376_v12 = vmul.f32 %v372_v7, %v372_v7 }
  0x4f   : > { %630 = vmatpush2.msra.mxu0 %v520_v31  ;;  %707 = vmatpush2.msra.mxu1 %v522_v32  ;;  %v375_v9 = vmul.f32 %v371_v1, %v371_v1  ;;  %v377_v10 = vmul.f32 %v373_v2, %v373_v2 }
  0x50   : > { %631 = vmatprep.subr.mxu0 %v517_v33  ;;  %708 = vmatprep.subr.mxu1 %v519_v34  ;;  %v378_v15 = vadd.f32 %v376_v12, %v374_v11  ;;  %v807_v11 = vld [vmem:[#allocation2 + $0x120] sm:$0xff] }
  0x51   : > { %632 = vmatpush2.msra.mxu0 %v516_v36  ;;  %709 = vmatpush2.msra.mxu1 %v518_v37  ;;  %v385_v13 = vsel %vm357_vm0, %v375_v9, 0.0  ;;  %v386_v14 = vsel %vm357_vm0, %v377_v10, 0.0  ;;  %v808_v9 = vld [vmem:[#allocation2 + $0x128] sm:$0xff]  ;;  %v935_v12 = vld [vmem:[#allocation2 + $0x520] sm:$0xff] }
  0x52   : > { %633 = vmatprep.subr.mxu0 %v513_v38  ;;  %710 = vmatprep.subr.mxu1 %v515_v39  ;;  %v387_v16 = vadd.f32 %v386_v14, %v385_v13  ;;  %v379_v17 = vrot.slane %v378_v15, 4  ;;  %v936_v10 = vld [vmem:[#allocation2 + $0x528] sm:$0xff] }
  0x53   : > { %634 = vmatpush2.msra.mxu0 %v512_v41  ;;  %711 = vmatpush2.msra.mxu1 %v514_v42  ;;  %v804_v13 = vld [vmem:[#allocation2 + $0x108] sm:$0xff] }
  0x54   : > { %635 = vmatprep.subr.mxu0 %v509_v44  ;;  %712 = vmatprep.subr.mxu1 %v511_v45  ;;  %v388_v18 = vrot.slane %v387_v16, 4  ;;  %v380_v19 = vadd.f32 %v379_v17, %v378_v15  ;;  %v932_v14 = vld [vmem:[#allocation2 + $0x508] sm:$0xff]  ;;  %v803_v15 = vld [vmem:[#allocation2 + $0x100] sm:$0xff] }
  0x55   : > { %636 = vmatpush2.msra.mxu0 %v508_v46  ;;  %713 = vmatpush2.msra.mxu1 %v510_v47  ;;  %v831_v46 = vld [vmem:[#allocation2 + $0x1e0] sm:$0xff]  ;;  %v800_v17 = vld [vmem:[#allocation2 + $0xe8] sm:$0xff] }
  0x56   : > { %637 = vmatprep.subr.mxu0 %v505_v49  ;;  %714 = vmatprep.subr.mxu1 %v507_v50  ;;  %v389_v4 = vadd.f32 %v388_v18, %v387_v16  ;;  %v381_v20 = vrot.slane %v380_v19, 2  ;;  %v959_v47 = vld [vmem:[#allocation2 + $0x5e0] sm:$0xff]  ;;  %v828_v49 = vld [vmem:[#allocation2 + $0x1c8] sm:$0xff] }
  0x57   : > { %638 = vmatpush2.msra.mxu0 %v504_v51  ;;  %715 = vmatpush2.msra.mxu1 %v506_v53  ;;  %v956_v50 = vld [vmem:[#allocation2 + $0x5c8] sm:$0xff]  ;;  %v827_v51 = vld [vmem:[#allocation2 + $0x1c0] sm:$0xff] }
  0x58   : > { %639 = vmatprep.subr.mxu0 %v501_v54  ;;  %716 = vmatprep.subr.mxu1 %v503_v55  ;;  %v390_v8 = vrot.slane %v389_v4, 2  ;;  %v382_v21 = vadd.f32 %v381_v20, %v380_v19  ;;  %v824_v53 = vld [vmem:[#allocation2 + $0x1a8] sm:$0xff]  ;;  %v823_v55 = vld [vmem:[#allocation2 + $0x1a0] sm:$0xff] }
  0x59   : > { %640 = vmatpush2.msra.mxu0 %v500_v56  ;;  %717 = vmatpush2.msra.mxu1 %v502_v58  ;;  %v952_v54 = vld [vmem:[#allocation2 + $0x5a8] sm:$0xff]  ;;  %v951_v56 = vld [vmem:[#allocation2 + $0x5a0] sm:$0xff] }
  0x5a   : > { %1049 = vmatprep.subr.mxu0 %v832_v59  ;;  %1126 = vmatprep.subr.mxu1 %v960_v60  ;;  %v391_v3 = vadd.f32 %v390_v8, %v389_v4  ;;  %v383_v22 = vrot.slane %v382_v21, 1  ;;  %v948_v58 = vld [vmem:[#allocation2 + $0x588] sm:$0xff]  ;;  %v819_v59 = vld [vmem:[#allocation2 + $0x180] sm:$0xff] }
  0x5b   : > { %v947_v60 = vld [vmem:[#allocation2 + $0x580] sm:$0xff]  ;;  %v928_v18 = vld [vmem:[#allocation2 + $0x4e8] sm:$0xff] }
  0x5c   : > { %v392_v5 = vrot.slane %v391_v3, 1  ;;  %v384_v23 = vadd.f32 %v383_v22, %v382_v21  ;;  %v931_v16 = vld [vmem:[#allocation2 + $0x500] sm:$0xff]  ;;  %v796_v20 = vld [vmem:[#allocation2 + $0xc8] sm:$0xff] }
  0x5d   : > { %v799_v19 = vld [vmem:[#allocation2 + $0xe0] sm:$0xff]  ;;  %v924_v8 = vld [vmem:[#allocation2 + $0x4c8] sm:$0xff] }
  0x5e   : > { %v393_v24 = vadd.f32 %v392_v5, %v391_v3  ;;  %v394_v25 = vmul.f32 0.0625, %v384_v23  ;;  %v927_v4 = vld [vmem:[#allocation2 + $0x4e0] sm:$0xff]  ;;  %v792_v22 = vld [vmem:[#allocation2 + $0xa8] sm:$0xff] }
  0x5f   : > { %v795_v21 = vld [vmem:[#allocation2 + $0xc0] sm:$0xff]  ;;  %v920_v5 = vld [vmem:[#allocation2 + $0x4a8] sm:$0xff] }
  0x60   : > { %v395_v26 = vmul.f32 0.0625, %v393_v24  ;;  %v396_v27 = vadd.f32 1e-05, %v394_v25  ;;  %v923_v3 = vld [vmem:[#allocation2 + $0x4c0] sm:$0xff]  ;;  %v788_v25 = vld [vmem:[#allocation2 + $0x88] sm:$0xff] }
  0x61   : > { %v791_v23 = vld [vmem:[#allocation2 + $0xa0] sm:$0xff] }
  0x62   : > { %v397_v28 = vadd.f32 1e-05, %v395_v26  ;;  %1868 = vrsqrt.f32 %v396_v27  ;;  %v919_v24 = vld [vmem:[#allocation2 + $0x4a0] sm:$0xff]  ;;  %v916_v26 = vld [vmem:[#allocation2 + $0x488] sm:$0xff] }
  0x63   : > { %v787_v27 = vld [vmem:[#allocation2 + $0x80] sm:$0xff] }
  0x64   : > { %1870 = vrsqrt.f32 %v397_v28  ;;  %v915_v28 = vld [vmem:[#allocation2 + $0x480] sm:$0xff] }
  0x6f   : > { %v1869_v29 = vpop.eup %1868 }
  0x70   : > { %v400_v32 = vmul.f32 %v1869_v29, %v370_v6  ;;  %v402_v36 = vmul.f32 %v1869_v29, %v372_v7  ;;  %v811_v6 = vld [vmem:[#allocation2 + $0x140] sm:$0xff]  ;;  %v784_v29 = vld [vmem:[#allocation2 + $0x68] sm:$0xff] }
  0x71   : > { %v1871_v30 = vpop.eup %1870  ;;  %v939_v7 = vld [vmem:[#allocation2 + $0x540] sm:$0xff] }
  0x72   : > { %v403_v31 = vmul.f32 %v1871_v30, %v373_v2  ;;  %v401_v33 = vmul.f32 %v1871_v30, %v371_v1  ;;  %v812_v1 = vld [vmem:[#allocation2 + $0x148] sm:$0xff] }
  0x73   : > { %v940_v2 = vld [vmem:[#allocation2 + $0x548] sm:$0xff] }
  0x74   : > { %v912_v30 = vld [vmem:[#allocation2 + $0x468] sm:$0xff] }
  0xa1   : > { %v409_v34 = vpop.permute.xlu0 %408  ;;  %v414_v35 = vpop.permute.xlu1 %413 }
  0xa2   : > { %v419_v37 = vmul.f32 %v414_v35, %v403_v31  ;;  %v416_v38 = vmul.f32 %v409_v34, %v400_v32  ;;  %v417_v39 = vmul.f32 %v409_v34, %v401_v33  ;;  %v418_v40 = vmul.f32 %v414_v35, %v402_v36  ;;  %v783_v31 = vld [vmem:[#allocation2 + $0x60] sm:$0xff]  ;;  %v780_v33 = vld [vmem:[#allocation2 + $0x48] sm:$0xff] }
  0xa3   : > { %v911_v32 = vld [vmem:[#allocation2 + $0x460] sm:$0xff]  ;;  %v908_v34 = vld [vmem:[#allocation2 + $0x448] sm:$0xff] }
  0xa4   : > { %v779_v35 = vld [vmem:[#allocation2 + $0x40] sm:$0xff] }
  0xa5   : > { %v425_v41 = vpop.permute.xlu0 %424  ;;  %v430_v42 = vpop.permute.xlu1 %429  ;;  %v907_v36 = vld [vmem:[#allocation2 + $0x440] sm:$0xff] }
  0xa6   : > { %v432_v43 = vadd.f32 %v425_v41, %v416_v38  ;;  %v433_v44 = vadd.f32 %v425_v41, %v417_v39  ;;  %v435_v45 = vadd.f32 %v430_v42, %v419_v37  ;;  %v434_v48 = vadd.f32 %v430_v42, %v418_v40  ;;  %v776_v37 = vld [vmem:[#allocation2 + $0x28] sm:$0xff]  ;;  %v775_v39 = vld [vmem:[#allocation2 + $0x20] sm:$0xff] }
  0xa7   : > { %v904_v38 = vld [vmem:[#allocation2 + $0x428] sm:$0xff]  ;;  %v903_v40 = vld [vmem:[#allocation2 + $0x420] sm:$0xff] }
  0xa8   : > { %1798 = vmatprep.mubr.msk.f32.mxu0 %vm357_vm0, %v433_v44  ;;  %1802 = vmatprep.mubr.msk.f32.mxu1 %vm357_vm0, %v433_v44  ;;  %v772_v41 = vld [vmem:[#allocation2 + $0x8] sm:$0xff]  ;;  %v899_v44 = vld [vmem:[#allocation2 + $0x400] sm:$0xff] }
  0xa9   : > { %642 = vmatmul.mubr.f32.vlgmr.msra.gmra.mxu0 %v432_v43  ;;  %719 = vmatmul.mubr.f32.vlgmr.msra.gmra.mxu1 %v432_v43  ;;  %v900_v42 = vld [vmem:[#allocation2 + $0x408] sm:$0xff]  ;;  %v771_v43 = vld [vmem:[#allocation2] sm:$0xff] }
  0xaa   : > { %1799 = vmatprep.mubr.msk.f32.mxu0 %vm357_vm0, %v435_v45  ;;  %1803 = vmatprep.mubr.msk.f32.mxu1 %vm357_vm0, %v435_v45  ;;  %v896_v45 = vld [vmem:[#allocation2 + $0x3e8] sm:$0xff] }
  0xab   : > { %1050 = vmatpush1.msra.mxu0 %v831_v46  ;;  %1127 = vmatpush1.msra.mxu1 %v959_v47  ;;  %v1024_v46 = vld [vmem:[#allocation2 + $0x7e8] sm:$0xff]  ;;  %v895_v47 = vld [vmem:[#allocation2 + $0x3e0] sm:$0xff] }
  0xac   : > { %1051 = vmatprep.subr.mxu0 %v828_v49  ;;  %1128 = vmatprep.subr.mxu1 %v956_v50  ;;  %v892_v49 = vld [vmem:[#allocation2 + $0x3c8] sm:$0xff] }
  0xad   : > { %648 = vmatmul.mubr.f32.gmra.mxu0 %v434_v48  ;;  %725 = vmatmul.mubr.f32.gmra.mxu1 %v434_v48  ;;  %v1023_v48 = vld [vmem:[#allocation2 + $0x7e0] sm:$0xff]  ;;  %v1020_v50 = vld [vmem:[#allocation2 + $0x7c8] sm:$0xff] }
  0xae   : > { %1052 = vmatpush1.msra.mxu0 %v827_v51  ;;  %1129 = vmatpush1.msra.mxu1 %v955_v52  ;;  %v891_v51 = vld [vmem:[#allocation2 + $0x3c0] sm:$0xff] }
  0xaf   : > { %1053 = vmatprep.subr.mxu0 %v824_v53  ;;  %1130 = vmatprep.subr.mxu1 %v952_v54  ;;  %v1019_v52 = vld [vmem:[#allocation2 + $0x7c0] sm:$0xff]  ;;  %v888_v53 = vld [vmem:[#allocation2 + $0x3a8] sm:$0xff] }
  0xb0   : > { %1054 = vmatpush1.msra.mxu0 %v823_v55  ;;  %1131 = vmatpush1.msra.mxu1 %v951_v56  ;;  %v1016_v54 = vld [vmem:[#allocation2 + $0x7a8] sm:$0xff]  ;;  %v887_v55 = vld [vmem:[#allocation2 + $0x3a0] sm:$0xff] }
  0xb1   : > { %1055 = vmatprep.subr.mxu0 %v820_v57  ;;  %1132 = vmatprep.subr.mxu1 %v948_v58  ;;  %v1015_v56 = vld [vmem:[#allocation2 + $0x7a0] sm:$0xff]  ;;  %v884_v57 = vld [vmem:[#allocation2 + $0x388] sm:$0xff] }
  0xb2   : > { %1056 = vmatpush1.msra.mxu0 %v819_v59  ;;  %1133 = vmatpush1.msra.mxu1 %v947_v60  ;;  %v1012_v58 = vld [vmem:[#allocation2 + $0x788] sm:$0xff]  ;;  %v883_v59 = vld [vmem:[#allocation2 + $0x380] sm:$0xff] }
  0xb3   : > { %1057 = vmatprep.subr.mxu0 %v816_v61  ;;  %1134 = vmatprep.subr.mxu1 %v944_v62  ;;  %v1011_v60 = vld [vmem:[#allocation2 + $0x780] sm:$0xff]  ;;  %v880_v61 = vld [vmem:[#allocation2 + $0x368] sm:$0xff] }
  0xb4   : > { %1058 = vmatpush1.msra.mxu0 %v815_v63  ;;  %1135 = vmatpush1.msra.mxu1 %v943_v0  ;;  %v1008_v62 = vld [vmem:[#allocation2 + $0x768] sm:$0xff]  ;;  %v879_v63 = vld [vmem:[#allocation2 + $0x360] sm:$0xff] }
  0xb5   : > { %1059 = vmatprep.subr.mxu0 %v812_v1  ;;  %1136 = vmatprep.subr.mxu1 %v940_v2  ;;  %v1007_v0 = vld [vmem:[#allocation2 + $0x760] sm:$0xff]  ;;  %v876_v1 = vld [vmem:[#allocation2 + $0x348] sm:$0xff] }
  0xb6   : > { %1060 = vmatpush1.msra.mxu0 %v811_v6  ;;  %1137 = vmatpush1.msra.mxu1 %v939_v7  ;;  %v1004_v2 = vld [vmem:[#allocation2 + $0x748] sm:$0xff]  ;;  %v875_v6 = vld [vmem:[#allocation2 + $0x340] sm:$0xff] }
  0xb7   : > { %1061 = vmatprep.subr.mxu0 %v808_v9  ;;  %1138 = vmatprep.subr.mxu1 %v936_v10  ;;  %v1003_v7 = vld [vmem:[#allocation2 + $0x740] sm:$0xff]  ;;  %v872_v9 = vld [vmem:[#allocation2 + $0x328] sm:$0xff] }
  0xb8   : > { %1062 = vmatpush1.msra.mxu0 %v807_v11  ;;  %1139 = vmatpush1.msra.mxu1 %v935_v12  ;;  %v1000_v10 = vld [vmem:[#allocation2 + $0x728] sm:$0xff]  ;;  %v871_v11 = vld [vmem:[#allocation2 + $0x320] sm:$0xff] }
  0xb9   : > { %1063 = vmatprep.subr.mxu0 %v804_v13  ;;  %1140 = vmatprep.subr.mxu1 %v932_v14  ;;  %v999_v12 = vld [vmem:[#allocation2 + $0x720] sm:$0xff]  ;;  %v868_v13 = vld [vmem:[#allocation2 + $0x308] sm:$0xff] }
  0xba   : > { %1064 = vmatpush1.msra.mxu0 %v803_v15  ;;  %1141 = vmatpush1.msra.mxu1 %v931_v16  ;;  %v996_v14 = vld [vmem:[#allocation2 + $0x708] sm:$0xff]  ;;  %v867_v15 = vld [vmem:[#allocation2 + $0x300] sm:$0xff] }
  0xbb   : > { %1065 = vmatprep.subr.mxu0 %v800_v17  ;;  %1142 = vmatprep.subr.mxu1 %v928_v18  ;;  %v995_v16 = vld [vmem:[#allocation2 + $0x700] sm:$0xff]  ;;  %v864_v17 = vld [vmem:[#allocation2 + $0x2e8] sm:$0xff] }
  0xbc   : > { %1066 = vmatpush1.msra.mxu0 %v799_v19  ;;  %1143 = vmatpush1.msra.mxu1 %v927_v4  ;;  %v992_v18 = vld [vmem:[#allocation2 + $0x6e8] sm:$0xff]  ;;  %v863_v19 = vld [vmem:[#allocation2 + $0x2e0] sm:$0xff] }
  0xbd   : > { %1067 = vmatprep.subr.mxu0 %v796_v20  ;;  %1144 = vmatprep.subr.mxu1 %v924_v8  ;;  %v991_v4 = vld [vmem:[#allocation2 + $0x6e0] sm:$0xff]  ;;  %v860_v20 = vld [vmem:[#allocation2 + $0x2c8] sm:$0xff] }
  0xbe   : > { %1068 = vmatpush1.msra.mxu0 %v795_v21  ;;  %1145 = vmatpush1.msra.mxu1 %v923_v3  ;;  %v988_v8 = vld [vmem:[#allocation2 + $0x6c8] sm:$0xff]  ;;  %v859_v21 = vld [vmem:[#allocation2 + $0x2c0] sm:$0xff] }
  0xbf   : > { %1069 = vmatprep.subr.mxu0 %v792_v22  ;;  %1146 = vmatprep.subr.mxu1 %v920_v5  ;;  %v987_v3 = vld [vmem:[#allocation2 + $0x6c0] sm:$0xff]  ;;  %v856_v22 = vld [vmem:[#allocation2 + $0x2a8] sm:$0xff] }
  0xc0   : > { %1070 = vmatpush1.msra.mxu0 %v791_v23  ;;  %1147 = vmatpush1.msra.mxu1 %v919_v24  ;;  %v984_v5 = vld [vmem:[#allocation2 + $0x6a8] sm:$0xff]  ;;  %v855_v23 = vld [vmem:[#allocation2 + $0x2a0] sm:$0xff] }
  0xc1   : > { %1071 = vmatprep.subr.mxu0 %v788_v25  ;;  %1148 = vmatprep.subr.mxu1 %v916_v26  ;;  %v983_v24 = vld [vmem:[#allocation2 + $0x6a0] sm:$0xff]  ;;  %v852_v25 = vld [vmem:[#allocation2 + $0x288] sm:$0xff] }
  0xc2   : > { %1072 = vmatpush1.msra.mxu0 %v787_v27  ;;  %1149 = vmatpush1.msra.mxu1 %v915_v28  ;;  %v980_v26 = vld [vmem:[#allocation2 + $0x688] sm:$0xff]  ;;  %v851_v27 = vld [vmem:[#allocation2 + $0x280] sm:$0xff] }
  0xc3   : > { %1073 = vmatprep.subr.mxu0 %v784_v29  ;;  %1150 = vmatprep.subr.mxu1 %v912_v30  ;;  %v979_v28 = vld [vmem:[#allocation2 + $0x680] sm:$0xff]  ;;  %v848_v29 = vld [vmem:[#allocation2 + $0x268] sm:$0xff] }
  0xc4   : > { %1074 = vmatpush1.msra.mxu0 %v783_v31  ;;  %1151 = vmatpush1.msra.mxu1 %v911_v32  ;;  %v976_v30 = vld [vmem:[#allocation2 + $0x668] sm:$0xff]  ;;  %v847_v31 = vld [vmem:[#allocation2 + $0x260] sm:$0xff] }
  0xc5   : > { %1075 = vmatprep.subr.mxu0 %v780_v33  ;;  %1152 = vmatprep.subr.mxu1 %v908_v34  ;;  %v975_v32 = vld [vmem:[#allocation2 + $0x660] sm:$0xff]  ;;  %v844_v33 = vld [vmem:[#allocation2 + $0x248] sm:$0xff] }
  0xc6   : > { %1076 = vmatpush1.msra.mxu0 %v779_v35  ;;  %1153 = vmatpush1.msra.mxu1 %v907_v36  ;;  %v972_v34 = vld [vmem:[#allocation2 + $0x648] sm:$0xff]  ;;  %v843_v35 = vld [vmem:[#allocation2 + $0x240] sm:$0xff] }
  0xc7   : > { %1077 = vmatprep.subr.mxu0 %v776_v37  ;;  %1154 = vmatprep.subr.mxu1 %v904_v38  ;;  %v971_v36 = vld [vmem:[#allocation2 + $0x640] sm:$0xff]  ;;  %v840_v37 = vld [vmem:[#allocation2 + $0x228] sm:$0xff] }
  0xc8   : > { %1078 = vmatpush1.msra.mxu0 %v775_v39  ;;  %1155 = vmatpush1.msra.mxu1 %v903_v40  ;;  %v968_v38 = vld [vmem:[#allocation2 + $0x628] sm:$0xff]  ;;  %v839_v39 = vld [vmem:[#allocation2 + $0x220] sm:$0xff] }
  0xc9   : > { %1079 = vmatprep.subr.mxu0 %v772_v41  ;;  %1156 = vmatprep.subr.mxu1 %v900_v42  ;;  %v967_v40 = vld [vmem:[#allocation2 + $0x620] sm:$0xff]  ;;  %v836_v41 = vld [vmem:[#allocation2 + $0x208] sm:$0xff] }
  0xca   : > { %1080 = vmatpush1.msra.mxu0 %v771_v43  ;;  %1157 = vmatpush1.msra.mxu1 %v899_v44  ;;  %v964_v42 = vld [vmem:[#allocation2 + $0x608] sm:$0xff]  ;;  %v835_v43 = vld [vmem:[#allocation2 + $0x200] sm:$0xff] }
  0xcb   : > { %1081 = vmatprep.subr.mxu0 %v896_v45  ;;  %1158 = vmatprep.subr.mxu1 %v1024_v46  ;;  %v963_v44 = vld [vmem:[#allocation2 + $0x600] sm:$0xff]  ;;  %v834_v45 = vld [vmem:[#allocation2 + $0x1f8] sm:$0xff] }
  0xcc   : > { %1082 = vmatpush2.msra.mxu0 %v895_v47  ;;  %1159 = vmatpush2.msra.mxu1 %v1023_v48  ;;  %v962_v46 = vld [vmem:[#allocation2 + $0x5f8] sm:$0xff]  ;;  %v538_v47 = vlaneseq }
  0xcd   : > { %1083 = vmatprep.subr.mxu0 %v892_v49  ;;  %1160 = vmatprep.subr.mxu1 %v1020_v50 }
  0xce   : > { %1084 = vmatpush2.msra.mxu0 %v891_v51  ;;  %1161 = vmatpush2.msra.mxu1 %v1019_v52  ;;  %v2479_v48 = vshrl.u32 %v538_v47, 7  ;;  %v536_v51 = vld [vmem:[%s2983_s4] sm:$0xf] }
  0xcf   : > { %1085 = vmatprep.subr.mxu0 %v888_v53  ;;  %1162 = vmatprep.subr.mxu1 %v1016_v54 }
  0xd0   : > { %1086 = vmatpush2.msra.mxu0 %v887_v55  ;;  %1163 = vmatpush2.msra.mxu1 %v1015_v56  ;;  %v2482_v49 = vsub.s32 0, %v2479_v48  ;;  %v548_v50 = vsub.s32 2, %v2479_v48  ;;  %v2489_v52 = vsub.s32 1, %v2479_v48  ;;  %v552_v53 = vsub.s32 3, %v2479_v48 }
  0xd1   : > { %1087 = vmatprep.subr.mxu0 %v884_v57  ;;  %1164 = vmatprep.subr.mxu1 %v1012_v58 }
  0xd2   : > { %1088 = vmatpush2.msra.mxu0 %v883_v59  ;;  %1165 = vmatpush2.msra.mxu1 %v1011_v60  ;;  %v541_v54 = vrot.slane %v536_v51, %v2482_v49  ;;  %v549_v55 = vrot.slane %v536_v51, %v548_v50  ;;  %v545_v58 = vrot.slane %v536_v51, %v2489_v52 }
  0xd3   : > { %1089 = vmatprep.subr.mxu0 %v880_v61  ;;  %1166 = vmatprep.subr.mxu1 %v1008_v62  ;;  %v553_v59 = vrot.slane %v536_v51, %v552_v53  ;;  %v958_v51 = vld [vmem:[#allocation2 + $0x5d8] sm:$0xff] }
  0xd4   : > { %1090 = vmatpush2.msra.mxu0 %v879_v63  ;;  %1167 = vmatpush2.msra.mxu1 %v1007_v0 }
  0xd5   : > { %1091 = vmatprep.subr.mxu0 %v876_v1  ;;  %1168 = vmatprep.subr.mxu1 %v1004_v2 }
  0xd6   : > { %1092 = vmatpush2.msra.mxu0 %v875_v6  ;;  %1169 = vmatpush2.msra.mxu1 %v1003_v7 }
  0xd7   : > { %1093 = vmatprep.subr.mxu0 %v872_v9  ;;  %1170 = vmatprep.subr.mxu1 %v1000_v10 }
  0xd8   : > { %1094 = vmatpush2.msra.mxu0 %v871_v11  ;;  %1171 = vmatpush2.msra.mxu1 %v999_v12 }
  0xd9   : > { %1095 = vmatprep.subr.mxu0 %v868_v13  ;;  %1172 = vmatprep.subr.mxu1 %v996_v14 }
  0xda   : > { %1096 = vmatpush2.msra.mxu0 %v867_v15  ;;  %1173 = vmatpush2.msra.mxu1 %v995_v16 }
  0xdb   : > { %1097 = vmatprep.subr.mxu0 %v864_v17  ;;  %1174 = vmatprep.subr.mxu1 %v992_v18 }
  0xdc   : > { %1098 = vmatpush2.msra.mxu0 %v863_v19  ;;  %1175 = vmatpush2.msra.mxu1 %v991_v4 }
  0xdd   : > { %1099 = vmatprep.subr.mxu0 %v860_v20  ;;  %1176 = vmatprep.subr.mxu1 %v988_v8 }
  0xde   : > { %1100 = vmatpush2.msra.mxu0 %v859_v21  ;;  %1177 = vmatpush2.msra.mxu1 %v987_v3 }
  0xdf   : > { %1101 = vmatprep.subr.mxu0 %v856_v22  ;;  %1178 = vmatprep.subr.mxu1 %v984_v5 }
  0xe0   : > { %1102 = vmatpush2.msra.mxu0 %v855_v23  ;;  %1179 = vmatpush2.msra.mxu1 %v983_v24 }
  0xe1   : > { %1103 = vmatprep.subr.mxu0 %v852_v25  ;;  %1180 = vmatprep.subr.mxu1 %v980_v26 }
  0xe2   : > { %1104 = vmatpush2.msra.mxu0 %v851_v27  ;;  %1181 = vmatpush2.msra.mxu1 %v979_v28 }
  0xe3   : > { %1105 = vmatprep.subr.mxu0 %v848_v29  ;;  %1182 = vmatprep.subr.mxu1 %v976_v30 }
  0xe4   : > { %1106 = vmatpush2.msra.mxu0 %v847_v31  ;;  %1183 = vmatpush2.msra.mxu1 %v975_v32 }
  0xe5   : > { %1107 = vmatprep.subr.mxu0 %v844_v33  ;;  %1184 = vmatprep.subr.mxu1 %v972_v34 }
  0xe6   : > { %1108 = vmatpush2.msra.mxu0 %v843_v35  ;;  %1185 = vmatpush2.msra.mxu1 %v971_v36 }
  0xe7   : > { %1109 = vmatprep.subr.mxu0 %v840_v37  ;;  %1186 = vmatprep.subr.mxu1 %v968_v38 }
  0xe8   : > { %1110 = vmatpush2.msra.mxu0 %v839_v39  ;;  %1187 = vmatpush2.msra.mxu1 %v967_v40  ;;  %v833_v39 = vld [vmem:[#allocation2 + $0x1f0] sm:$0xff] }
  0xe9   : > { %1111 = vmatprep.subr.mxu0 %v836_v41  ;;  %1188 = vmatprep.subr.mxu1 %v964_v42 }
  0xea   : > { %1112 = vmatpush2.msra.mxu0 %v835_v43  ;;  %1189 = vmatpush2.msra.mxu1 %v963_v44  ;;  %v961_v44 = vld [vmem:[#allocation2 + $0x5f0] sm:$0xff] }
  0xeb   : > { %1203 = vmatprep.subr.mxu0 %v834_v45  ;;  %1280 = vmatprep.subr.mxu1 %v962_v46  ;;  %v830_v45 = vld [vmem:[#allocation2 + $0x1d8] sm:$0xff] }
 0x169   : > { %v643_v56 = vpop.f32.mrf.mxu0  ;;  %v720_v57 = vpop.f32.mrf.mxu1 }
 0x16a   : > { %v644_v60 = vadd.f32 %v643_v56, %v541_v54  ;;  %v721_v61 = vadd.f32 %v720_v57, %v549_v55  ;;  %v957_v56 = vld [vmem:[#allocation2 + $0x5d0] sm:$0xff] }
 0x16b   : > { %v645_v62 = vpop.f32.mrf.mxu0  ;;  %v722_v63 = vpop.f32.mrf.mxu1 }
 0x16c   : > { %v739_v0 = vmul.f32 0.70710677, %v644_v60  ;;  %v741_v1 = vmul.f32 0.70710677, %v721_v61  ;;  %v646_v2 = vadd.f32 %v645_v62, %v545_v58  ;;  %v723_v6 = vadd.f32 %v722_v63, %v553_v59  ;;  %v825_v63 = vld [vmem:[#allocation2 + $0x1b0] sm:$0xff] }
 0x16d   : > { %v649_v7 = vpop.f32.mrf.mxu0  ;;  %v726_v9 = vpop.f32.mrf.mxu1  ;;  %v731_v27 = vmul.f32 0.5, %v644_v60  ;;  %v733_v31 = vmul.f32 0.5, %v721_v61  ;;  %v954_v61 = vld [vmem:[#allocation2 + $0x5b8] sm:$0xff] }
 0x16e   : > { %1872 = verf.f32 %v739_v0  ;;  %v650_v10 = vadd.f32 %v649_v7, %v541_v54  ;;  %v727_v11 = vadd.f32 %v726_v9, %v549_v55  ;;  %v740_v12 = vmul.f32 0.70710677, %v646_v2  ;;  %v829_v54 = vld [vmem:[#allocation2 + $0x1d0] sm:$0xff]  ;;  %v818_v9 = vld [vmem:[#allocation2 + $0x178] sm:$0xff] }
 0x16f   : > { %1874 = verf.f32 %v741_v1  ;;  %v651_v13 = vpop.f32.mrf.mxu0  ;;  %v728_v14 = vpop.f32.mrf.mxu1  ;;  %v742_v15 = vmul.f32 0.70710677, %v723_v6  ;;  %v732_v24 = vmul.f32 0.5, %v646_v2  ;;  %v734_v28 = vmul.f32 0.5, %v723_v6  ;;  %v953_v0 = vld [vmem:[#allocation2 + $0x5b0] sm:$0xff]  ;;  %v822_v1 = vld [vmem:[#allocation2 + $0x198] sm:$0xff] }
 0x170   : > { %v743_v16 = vmul.f32 0.70710677, %v650_v10  ;;  %1876 = verf.f32 %v740_v12  ;;  %v745_v17 = vmul.f32 0.70710677, %v727_v11  ;;  %v652_v18 = vadd.f32 %v651_v13, %v545_v58  ;;  %v950_v2 = vld [vmem:[#allocation2 + $0x598] sm:$0xff]  ;;  %v821_v6 = vld [vmem:[#allocation2 + $0x190] sm:$0xff] }
 0x171   : > { %v729_v19 = vadd.f32 %v728_v14, %v553_v59  ;;  %1878 = verf.f32 %v742_v15  ;;  %v735_v32 = vmul.f32 0.5, %v650_v10  ;;  %v737_v43 = vmul.f32 0.5, %v727_v11  ;;  %v826_v59 = vld [vmem:[#allocation2 + $0x1b8] sm:$0xff]  ;;  %v949_v7 = vld [vmem:[#allocation2 + $0x590] sm:$0xff] }
 0x172   : > { %1880 = verf.f32 %v743_v16  ;;  %v744_v4 = vmul.f32 0.70710677, %v652_v18  ;;  %v736_v33 = vmul.f32 0.5, %v652_v18  ;;  %v946_v10 = vld [vmem:[#allocation2 + $0x578] sm:$0xff]  ;;  %v817_v11 = vld [vmem:[#allocation2 + $0x170] sm:$0xff] }
 0x173   : > { %1882 = verf.f32 %v745_v17  ;;  %v746_v20 = vmul.f32 0.70710677, %v729_v19  ;;  %v738_v37 = vmul.f32 0.5, %v729_v19  ;;  %v945_v12 = vld [vmem:[#allocation2 + $0x570] sm:$0xff]  ;;  %v814_v13 = vld [vmem:[#allocation2 + $0x158] sm:$0xff] }
 0x174   : > { %1884 = verf.f32 %v744_v4  ;;  %v942_v14 = vld [vmem:[#allocation2 + $0x558] sm:$0xff]  ;;  %v813_v15 = vld [vmem:[#allocation2 + $0x150] sm:$0xff] }
 0x175   : > { %1886 = verf.f32 %v746_v20  ;;  %v941_v16 = vld [vmem:[#allocation2 + $0x550] sm:$0xff]  ;;  %v810_v17 = vld [vmem:[#allocation2 + $0x138] sm:$0xff] }
 0x176   : > { %v938_v18 = vld [vmem:[#allocation2 + $0x538] sm:$0xff]  ;;  %v809_v19 = vld [vmem:[#allocation2 + $0x130] sm:$0xff] }
 0x177   : > { %v937_v4 = vld [vmem:[#allocation2 + $0x530] sm:$0xff]  ;;  %v806_v20 = vld [vmem:[#allocation2 + $0x118] sm:$0xff] }
 0x17b   : > { %v1873_v8 = vpop.eup %1872 }
 0x17c   : > { %v1875_v21 = vpop.eup %1874  ;;  %v755_v22 = vadd.f32 1.0, %v1873_v8  ;;  %v934_v8 = vld [vmem:[#allocation2 + $0x518] sm:$0xff] }
 0x17d   : > { %v1877_v3 = vpop.eup %1876  ;;  %v757_v23 = vadd.f32 1.0, %v1875_v21  ;;  %v805_v21 = vld [vmem:[#allocation2 + $0x110] sm:$0xff] }
 0x17e   : > { %v1879_v5 = vpop.eup %1878  ;;  %v756_v25 = vadd.f32 1.0, %v1877_v3  ;;  %v2498_v36 = vmul.f32 %v755_v22, %v731_v27  ;;  %v933_v3 = vld [vmem:[#allocation2 + $0x510] sm:$0xff]  ;;  %v802_v22 = vld [vmem:[#allocation2 + $0xf8] sm:$0xff] }
 0x17f   : > { %v1881_v26 = vpop.eup %1880  ;;  %v758_v29 = vadd.f32 1.0, %v1879_v5  ;;  %v2500_v42 = vmul.f32 %v757_v23, %v733_v31  ;;  %v930_v5 = vld [vmem:[#allocation2 + $0x4f8] sm:$0xff]  ;;  %v801_v23 = vld [vmem:[#allocation2 + $0xf0] sm:$0xff] }
 0x180   : > { %v1883_v30 = vpop.eup %1882  ;;  %v764_v34 = vmul.f32 %v756_v25, %v732_v24  ;;  %v759_v40 = vadd.f32 1.0, %v1881_v26  ;;  %v929_v24 = vld [vmem:[#allocation2 + $0x4f0] sm:$0xff]  ;;  %v798_v25 = vld [vmem:[#allocation2 + $0xd8] sm:$0xff] }
 0x181   : > { %v1885_v35 = vpop.eup %1884  ;;  %v766_v38 = vmul.f32 %v758_v29, %v734_v28  ;;  %v761_v47 = vadd.f32 1.0, %v1883_v30  ;;  %v926_v26 = vld [vmem:[#allocation2 + $0x4d8] sm:$0xff]  ;;  %v797_v27 = vld [vmem:[#allocation2 + $0xd0] sm:$0xff] }
 0x182   : > { %v1887_v41 = vpop.eup %1886  ;;  %1113 = vmatprep.mubr.f32.mxu0 %v764_v34  ;;  %v760_v46 = vadd.f32 1.0, %v1885_v35  ;;  %v2508_v60 = vmul.f32 %v759_v40, %v735_v32  ;;  %v925_v28 = vld [vmem:[#allocation2 + $0x4d0] sm:$0xff]  ;;  %v794_v29 = vld [vmem:[#allocation2 + $0xb8] sm:$0xff] }
 0x183   : > { %1190 = vmatprep.mubr.f32.mxu1 %v766_v38  ;;  %1114 = vmatmul.mubr.f32.vlgmr.msra.gmra.mxu0 %v2498_v36  ;;  %v762_v55 = vadd.f32 1.0, %v1887_v41  ;;  %v2510_v62 = vmul.f32 %v761_v47, %v737_v43  ;;  %v922_v30 = vld [vmem:[#allocation2 + $0x4b8] sm:$0xff]  ;;  %v793_v31 = vld [vmem:[#allocation2 + $0xb0] sm:$0xff] }
 0x184   : > { %1191 = vmatmul.mubr.f32.vlgmr.msra.gmra.mxu1 %v2500_v42  ;;  %1204 = vmatpush1.msra.mxu0 %v833_v39  ;;  %v2504_v57 = vmul.f32 %v760_v46, %v736_v33  ;;  %v921_v32 = vld [vmem:[#allocation2 + $0x4b0] sm:$0xff]  ;;  %v790_v33 = vld [vmem:[#allocation2 + $0x98] sm:$0xff] }
 0x185   : > { %1281 = vmatpush1.msra.mxu1 %v961_v44  ;;  %1205 = vmatprep.subr.mxu0 %v830_v45  ;;  %v2506_v58 = vmul.f32 %v762_v55, %v738_v37  ;;  %v789_v35 = vld [vmem:[#allocation2 + $0x90] sm:$0xff]  ;;  %v914_v39 = vld [vmem:[#allocation2 + $0x478] sm:$0xff] }
 0x186   : > { %1282 = vmatprep.subr.mxu1 %v958_v51  ;;  %1206 = vmatpush1.msra.mxu0 %v829_v54  ;;  %v917_v37 = vld [vmem:[#allocation2 + $0x490] sm:$0xff]  ;;  %v782_v43 = vld [vmem:[#allocation2 + $0x58] sm:$0xff] }
 0x187   : > { %1283 = vmatpush1.msra.mxu1 %v957_v56  ;;  %1119 = vmatprep.mubr.f32.mxu0 %v2504_v57  ;;  %v785_v40 = vld [vmem:[#allocation2 + $0x70] sm:$0xff]  ;;  %v910_v44 = vld [vmem:[#allocation2 + $0x458] sm:$0xff] }
 0x188   : > { %1196 = vmatprep.mubr.f32.mxu1 %v2506_v58  ;;  %1207 = vmatprep.subr.mxu0 %v826_v59  ;;  %v913_v41 = vld [vmem:[#allocation2 + $0x470] sm:$0xff]  ;;  %v778_v47 = vld [vmem:[#allocation2 + $0x38] sm:$0xff] }
 0x189   : > { %1284 = vmatprep.subr.mxu1 %v954_v61  ;;  %1120 = vmatmul.mubr.f32.gmra.mxu0 %v2508_v60  ;;  %v781_v45 = vld [vmem:[#allocation2 + $0x50] sm:$0xff]  ;;  %v906_v51 = vld [vmem:[#allocation2 + $0x438] sm:$0xff] }
 0x18a   : > { %1197 = vmatmul.mubr.f32.gmra.mxu1 %v2510_v62  ;;  %1208 = vmatpush1.msra.mxu0 %v825_v63  ;;  %v909_v46 = vld [vmem:[#allocation2 + $0x450] sm:$0xff]  ;;  %v774_v56 = vld [vmem:[#allocation2 + $0x18] sm:$0xff] }
 0x18b   : > { %1285 = vmatpush1.msra.mxu1 %v953_v0  ;;  %1209 = vmatprep.subr.mxu0 %v822_v1  ;;  %v777_v54 = vld [vmem:[#allocation2 + $0x30] sm:$0xff]  ;;  %v902_v59 = vld [vmem:[#allocation2 + $0x418] sm:$0xff] }
 0x18c   : > { %1267 = vmatprep.mubr.f32.mxu0 %v764_v34  ;;  %1286 = vmatprep.subr.mxu1 %v950_v2  ;;  %v918_v34 = vld [vmem:[#allocation2 + $0x498] sm:$0xff]  ;;  %v905_v55 = vld [vmem:[#allocation2 + $0x430] sm:$0xff] }
 0x18d   : > { %1344 = vmatprep.mubr.f32.mxu1 %v766_v38  ;;  %1210 = vmatpush1.msra.mxu0 %v821_v6  ;;  %v786_v38 = vld [vmem:[#allocation2 + $0x78] sm:$0xff]  ;;  %v773_v61 = vld [vmem:[#allocation2 + $0x10] sm:$0xff] }
 0x18e   : > { %1287 = vmatpush1.msra.mxu1 %v949_v7  ;;  %1211 = vmatprep.subr.mxu0 %v818_v9  ;;  %v901_v63 = vld [vmem:[#allocation2 + $0x410] sm:$0xff]  ;;  %v898_v0 = vld [vmem:[#allocation2 + $0x3f8] sm:$0xff] }
 0x18f   : > { %1288 = vmatprep.subr.mxu1 %v946_v10  ;;  %1212 = vmatpush1.msra.mxu0 %v817_v11  ;;  %v1026_v1 = vld [vmem:[#allocation2 + $0x7f8] sm:$0xff]  ;;  %v897_v2 = vld [vmem:[#allocation2 + $0x3f0] sm:$0xff] }
 0x190   : > { %1289 = vmatpush1.msra.mxu1 %v945_v12  ;;  %1213 = vmatprep.subr.mxu0 %v814_v13  ;;  %v1025_v6 = vld [vmem:[#allocation2 + $0x7f0] sm:$0xff]  ;;  %v894_v7 = vld [vmem:[#allocation2 + $0x3d8] sm:$0xff] }
 0x191   : > { %1290 = vmatprep.subr.mxu1 %v942_v14  ;;  %1214 = vmatpush1.msra.mxu0 %v813_v15  ;;  %v1022_v9 = vld [vmem:[#allocation2 + $0x7d8] sm:$0xff]  ;;  %v893_v10 = vld [vmem:[#allocation2 + $0x3d0] sm:$0xff] }
 0x192   : > { %1291 = vmatpush1.msra.mxu1 %v941_v16  ;;  %1215 = vmatprep.subr.mxu0 %v810_v17  ;;  %v1021_v11 = vld [vmem:[#allocation2 + $0x7d0] sm:$0xff]  ;;  %v890_v12 = vld [vmem:[#allocation2 + $0x3b8] sm:$0xff] }
 0x193   : > { %1292 = vmatprep.subr.mxu1 %v938_v18  ;;  %1216 = vmatpush1.msra.mxu0 %v809_v19  ;;  %v1018_v13 = vld [vmem:[#allocation2 + $0x7b8] sm:$0xff]  ;;  %v889_v14 = vld [vmem:[#allocation2 + $0x3b0] sm:$0xff] }
 0x194   : > { %1293 = vmatpush1.msra.mxu1 %v937_v4  ;;  %1217 = vmatprep.subr.mxu0 %v806_v20  ;;  %v1017_v15 = vld [vmem:[#allocation2 + $0x7b0] sm:$0xff]  ;;  %v886_v16 = vld [vmem:[#allocation2 + $0x398] sm:$0xff] }
 0x195   : > { %1294 = vmatprep.subr.mxu1 %v934_v8  ;;  %1218 = vmatpush1.msra.mxu0 %v805_v21  ;;  %v1014_v17 = vld [vmem:[#allocation2 + $0x798] sm:$0xff]  ;;  %v885_v18 = vld [vmem:[#allocation2 + $0x390] sm:$0xff] }
 0x196   : > { %1295 = vmatpush1.msra.mxu1 %v933_v3  ;;  %1219 = vmatprep.subr.mxu0 %v802_v22  ;;  %v1013_v19 = vld [vmem:[#allocation2 + $0x790] sm:$0xff]  ;;  %v882_v4 = vld [vmem:[#allocation2 + $0x378] sm:$0xff] }
 0x197   : > { %1296 = vmatprep.subr.mxu1 %v930_v5  ;;  %1220 = vmatpush1.msra.mxu0 %v801_v23  ;;  %v1010_v20 = vld [vmem:[#allocation2 + $0x778] sm:$0xff]  ;;  %v881_v8 = vld [vmem:[#allocation2 + $0x370] sm:$0xff] }
 0x198   : > { %1297 = vmatpush1.msra.mxu1 %v929_v24  ;;  %1221 = vmatprep.subr.mxu0 %v798_v25  ;;  %v1009_v21 = vld [vmem:[#allocation2 + $0x770] sm:$0xff]  ;;  %v878_v3 = vld [vmem:[#allocation2 + $0x358] sm:$0xff] }
 0x199   : > { %1298 = vmatprep.subr.mxu1 %v926_v26  ;;  %1222 = vmatpush1.msra.mxu0 %v797_v27  ;;  %v1006_v22 = vld [vmem:[#allocation2 + $0x758] sm:$0xff]  ;;  %v877_v5 = vld [vmem:[#allocation2 + $0x350] sm:$0xff] }
 0x19a   : > { %1299 = vmatpush1.msra.mxu1 %v925_v28  ;;  %1223 = vmatprep.subr.mxu0 %v794_v29  ;;  %v1005_v23 = vld [vmem:[#allocation2 + $0x750] sm:$0xff]  ;;  %v874_v24 = vld [vmem:[#allocation2 + $0x338] sm:$0xff] }
 0x19b   : > { %1300 = vmatprep.subr.mxu1 %v922_v30  ;;  %1224 = vmatpush1.msra.mxu0 %v793_v31  ;;  %v1002_v25 = vld [vmem:[#allocation2 + $0x738] sm:$0xff]  ;;  %v873_v26 = vld [vmem:[#allocation2 + $0x330] sm:$0xff] }
 0x19c   : > { %1301 = vmatpush1.msra.mxu1 %v921_v32  ;;  %1225 = vmatprep.subr.mxu0 %v790_v33  ;;  %v1001_v27 = vld [vmem:[#allocation2 + $0x730] sm:$0xff]  ;;  %v870_v28 = vld [vmem:[#allocation2 + $0x318] sm:$0xff] }
 0x19d   : > { %1302 = vmatprep.subr.mxu1 %v918_v34  ;;  %1226 = vmatpush1.msra.mxu0 %v789_v35  ;;  %v998_v29 = vld [vmem:[#allocation2 + $0x718] sm:$0xff]  ;;  %v869_v30 = vld [vmem:[#allocation2 + $0x310] sm:$0xff] }
 0x19e   : > { %1303 = vmatpush1.msra.mxu1 %v917_v37  ;;  %1227 = vmatprep.subr.mxu0 %v786_v38  ;;  %v997_v31 = vld [vmem:[#allocation2 + $0x710] sm:$0xff]  ;;  %v866_v32 = vld [vmem:[#allocation2 + $0x2f8] sm:$0xff] }
 0x19f   : > { %1304 = vmatprep.subr.mxu1 %v914_v39  ;;  %1228 = vmatpush1.msra.mxu0 %v785_v40  ;;  %v994_v33 = vld [vmem:[#allocation2 + $0x6f8] sm:$0xff]  ;;  %v865_v34 = vld [vmem:[#allocation2 + $0x2f0] sm:$0xff] }
 0x1a0   : > { %1305 = vmatpush1.msra.mxu1 %v913_v41  ;;  %1229 = vmatprep.subr.mxu0 %v782_v43  ;;  %v993_v35 = vld [vmem:[#allocation2 + $0x6f0] sm:$0xff]  ;;  %v862_v37 = vld [vmem:[#allocation2 + $0x2d8] sm:$0xff] }
 0x1a1   : > { %1306 = vmatprep.subr.mxu1 %v910_v44  ;;  %1230 = vmatpush1.msra.mxu0 %v781_v45  ;;  %v990_v38 = vld [vmem:[#allocation2 + $0x6d8] sm:$0xff]  ;;  %v861_v39 = vld [vmem:[#allocation2 + $0x2d0] sm:$0xff] }
 0x1a2   : > { %1307 = vmatpush1.msra.mxu1 %v909_v46  ;;  %1231 = vmatprep.subr.mxu0 %v778_v47  ;;  %v989_v40 = vld [vmem:[#allocation2 + $0x6d0] sm:$0xff]  ;;  %v858_v41 = vld [vmem:[#allocation2 + $0x2b8] sm:$0xff] }
 0x1a3   : > { %1308 = vmatprep.subr.mxu1 %v906_v51  ;;  %1232 = vmatpush1.msra.mxu0 %v777_v54  ;;  %v986_v43 = vld [vmem:[#allocation2 + $0x6b8] sm:$0xff]  ;;  %v857_v44 = vld [vmem:[#allocation2 + $0x2b0] sm:$0xff] }
 0x1a4   : > { %1309 = vmatpush1.msra.mxu1 %v905_v55  ;;  %1233 = vmatprep.subr.mxu0 %v774_v56  ;;  %v985_v45 = vld [vmem:[#allocation2 + $0x6b0] sm:$0xff]  ;;  %v854_v46 = vld [vmem:[#allocation2 + $0x298] sm:$0xff] }
 0x1a5   : > { %1310 = vmatprep.subr.mxu1 %v902_v59  ;;  %1234 = vmatpush1.msra.mxu0 %v773_v61  ;;  %v982_v47 = vld [vmem:[#allocation2 + $0x698] sm:$0xff]  ;;  %v853_v51 = vld [vmem:[#allocation2 + $0x290] sm:$0xff] }
 0x1a6   : > { %1311 = vmatpush1.msra.mxu1 %v901_v63  ;;  %1235 = vmatprep.subr.mxu0 %v898_v0  ;;  %v981_v54 = vld [vmem:[#allocation2 + $0x690] sm:$0xff]  ;;  %v850_v55 = vld [vmem:[#allocation2 + $0x278] sm:$0xff] }
 0x1a7   : > { %1312 = vmatprep.subr.mxu1 %v1026_v1  ;;  %1236 = vmatpush2.msra.mxu0 %v897_v2  ;;  %v978_v56 = vld [vmem:[#allocation2 + $0x678] sm:$0xff]  ;;  %v849_v59 = vld [vmem:[#allocation2 + $0x270] sm:$0xff] }
 0x1a8   : > { %1313 = vmatpush2.msra.mxu1 %v1025_v6  ;;  %1237 = vmatprep.subr.mxu0 %v894_v7  ;;  %v977_v61 = vld [vmem:[#allocation2 + $0x670] sm:$0xff]  ;;  %v846_v63 = vld [vmem:[#allocation2 + $0x258] sm:$0xff] }
 0x1a9   : > { %1314 = vmatprep.subr.mxu1 %v1022_v9  ;;  %1238 = vmatpush2.msra.mxu0 %v893_v10  ;;  %v974_v0 = vld [vmem:[#allocation2 + $0x658] sm:$0xff]  ;;  %v845_v1 = vld [vmem:[#allocation2 + $0x250] sm:$0xff] }
 0x1aa   : > { %1315 = vmatpush2.msra.mxu1 %v1021_v11  ;;  %1239 = vmatprep.subr.mxu0 %v890_v12  ;;  %v973_v2 = vld [vmem:[#allocation2 + $0x650] sm:$0xff]  ;;  %v842_v6 = vld [vmem:[#allocation2 + $0x238] sm:$0xff] }
 0x1ab   : > { %1316 = vmatprep.subr.mxu1 %v1018_v13  ;;  %1240 = vmatpush2.msra.mxu0 %v889_v14  ;;  %v970_v7 = vld [vmem:[#allocation2 + $0x638] sm:$0xff]  ;;  %v841_v9 = vld [vmem:[#allocation2 + $0x230] sm:$0xff] }
 0x1ac   : > { %1317 = vmatpush2.msra.mxu1 %v1017_v15  ;;  %1241 = vmatprep.subr.mxu0 %v886_v16  ;;  %v969_v10 = vld [vmem:[#allocation2 + $0x630] sm:$0xff]  ;;  %v838_v11 = vld [vmem:[#allocation2 + $0x218] sm:$0xff] }
 0x1ad   : > { %1318 = vmatprep.subr.mxu1 %v1014_v17  ;;  %1242 = vmatpush2.msra.mxu0 %v885_v18  ;;  %v966_v12 = vld [vmem:[#allocation2 + $0x618] sm:$0xff]  ;;  %v837_v13 = vld [vmem:[#allocation2 + $0x210] sm:$0xff]  ;;  %v1426_v17 = vld [vmem:[%s2986_s7 + $0xe8] sm:$0xff] }
 0x1ae   : > { %1319 = vmatpush2.msra.mxu1 %v1013_v19  ;;  %1243 = vmatprep.subr.mxu0 %v882_v4  ;;  %v965_v14 = vld [vmem:[#allocation2 + $0x610] sm:$0xff]  ;;  %v1428_v15 = vld [vmem:[%s2986_s7 + $0xf8] sm:$0xff]  ;;  %v1425_v18 = vld [vmem:[%s2986_s7 + $0xe0] sm:$0xff] }
 0x1af   : > { %1320 = vmatprep.subr.mxu1 %v1010_v20  ;;  %1244 = vmatpush2.msra.mxu0 %v881_v8  ;;  %v1427_v16 = vld [vmem:[%s2986_s7 + $0xf0] sm:$0xff]  ;;  %v1418_v19 = vld [vmem:[%s2986_s7 + $0xa8] sm:$0xff]  ;;  %v1417_v4 = vld [vmem:[%s2986_s7 + $0xa0] sm:$0xff] }
 0x1b0   : > { %1321 = vmatpush2.msra.mxu1 %v1009_v21  ;;  %1245 = vmatprep.subr.mxu0 %v878_v3  ;;  %v1416_v20 = vld [vmem:[%s2986_s7 + $0x98] sm:$0xff]  ;;  %v1415_v8 = vld [vmem:[%s2986_s7 + $0x90] sm:$0xff]  ;;  %v1414_v21 = vld [vmem:[%s2986_s7 + $0x88] sm:$0xff] }
 0x1b1   : > { %1322 = vmatprep.subr.mxu1 %v1006_v22  ;;  %1246 = vmatpush2.msra.mxu0 %v877_v5  ;;  %v1413_v3 = vld [vmem:[%s2986_s7 + $0x80] sm:$0xff]  ;;  %v1412_v22 = vld [vmem:[%s2986_s7 + $0x78] sm:$0xff]  ;;  %v1411_v5 = vld [vmem:[%s2986_s7 + $0x70] sm:$0xff] }
 0x1b2   : > { %1323 = vmatpush2.msra.mxu1 %v1005_v23  ;;  %1247 = vmatprep.subr.mxu0 %v874_v24  ;;  %v1410_v23 = vld [vmem:[%s2986_s7 + $0x68] sm:$0xff]  ;;  %v1409_v24 = vld [vmem:[%s2986_s7 + $0x60] sm:$0xff] }
 0x1b3   : > { %1324 = vmatprep.subr.mxu1 %v1002_v25  ;;  %1248 = vmatpush2.msra.mxu0 %v873_v26  ;;  %v1408_v25 = vld [vmem:[%s2986_s7 + $0x58] sm:$0xff]  ;;  %v1407_v26 = vld [vmem:[%s2986_s7 + $0x50] sm:$0xff] }
 0x1b4   : > { %1325 = vmatpush2.msra.mxu1 %v1001_v27  ;;  %1249 = vmatprep.subr.mxu0 %v870_v28  ;;  %v1406_v27 = vld [vmem:[%s2986_s7 + $0x48] sm:$0xff]  ;;  %v1405_v28 = vld [vmem:[%s2986_s7 + $0x40] sm:$0xff] }
 0x1b5   : > { %1326 = vmatprep.subr.mxu1 %v998_v29  ;;  %1250 = vmatpush2.msra.mxu0 %v869_v30  ;;  %v1404_v29 = vld [vmem:[%s2986_s7 + $0x38] sm:$0xff]  ;;  %v1403_v30 = vld [vmem:[%s2986_s7 + $0x30] sm:$0xff] }
 0x1b6   : > { %1327 = vmatpush2.msra.mxu1 %v997_v31  ;;  %1251 = vmatprep.subr.mxu0 %v866_v32  ;;  %v1402_v31 = vld [vmem:[%s2986_s7 + $0x28] sm:$0xff]  ;;  %v1492_v32 = vld [vmem:[%s2986_s7 + $0x2f8] sm:$0xff] }
 0x1b7   : > { %1328 = vmatprep.subr.mxu1 %v994_v33  ;;  %1252 = vmatpush2.msra.mxu0 %v865_v34  ;;  %v1491_v33 = vld [vmem:[%s2986_s7 + $0x2f0] sm:$0xff]  ;;  %v1490_v34 = vld [vmem:[%s2986_s7 + $0x2e8] sm:$0xff] }
 0x1b8   : > { %1329 = vmatpush2.msra.mxu1 %v993_v35  ;;  %1253 = vmatprep.subr.mxu0 %v862_v37  ;;  %v1489_v35 = vld [vmem:[%s2986_s7 + $0x2e0] sm:$0xff] }
 0x1b9   : > { %1330 = vmatprep.subr.mxu1 %v990_v38  ;;  %1254 = vmatpush2.msra.mxu0 %v861_v39  ;;  %v1401_v37 = vld [vmem:[%s2986_s7 + $0x20] sm:$0xff]  ;;  %v1488_v38 = vld [vmem:[%s2986_s7 + $0x2d8] sm:$0xff] }
 0x1ba   : > { %1331 = vmatpush2.msra.mxu1 %v989_v40  ;;  %1255 = vmatprep.subr.mxu0 %v858_v41  ;;  %v1400_v39 = vld [vmem:[%s2986_s7 + $0x18] sm:$0xff]  ;;  %v1487_v40 = vld [vmem:[%s2986_s7 + $0x2d0] sm:$0xff] }
 0x1bb   : > { %1332 = vmatprep.subr.mxu1 %v986_v43  ;;  %1256 = vmatpush2.msra.mxu0 %v857_v44  ;;  %v1399_v41 = vld [vmem:[%s2986_s7 + $0x10] sm:$0xff]  ;;  %v1486_v43 = vld [vmem:[%s2986_s7 + $0x2c8] sm:$0xff] }
 0x1bc   : > { %1333 = vmatpush2.msra.mxu1 %v985_v45  ;;  %1257 = vmatprep.subr.mxu0 %v854_v46  ;;  %v1398_v44 = vld [vmem:[%s2986_s7 + $0x8] sm:$0xff]  ;;  %v1485_v45 = vld [vmem:[%s2986_s7 + $0x2c0] sm:$0xff] }
 0x1bd   : > { %1334 = vmatprep.subr.mxu1 %v982_v47  ;;  %1258 = vmatpush2.msra.mxu0 %v853_v51  ;;  %v1397_v46 = vld [vmem:[%s2986_s7] sm:$0xff]  ;;  %v1484_v47 = vld [vmem:[%s2986_s7 + $0x2b8] sm:$0xff] }
 0x1be   : > { %1335 = vmatpush2.msra.mxu1 %v981_v54  ;;  %1259 = vmatprep.subr.mxu0 %v850_v55  ;;  %v1460_v51 = vld [vmem:[%s2986_s7 + $0x1f8] sm:$0xff]  ;;  %v1483_v54 = vld [vmem:[%s2986_s7 + $0x2b0] sm:$0xff] }
 0x1bf   : > { %1336 = vmatprep.subr.mxu1 %v978_v56  ;;  %1260 = vmatpush2.msra.mxu0 %v849_v59  ;;  %v1459_v55 = vld [vmem:[%s2986_s7 + $0x1f0] sm:$0xff]  ;;  %v1482_v56 = vld [vmem:[%s2986_s7 + $0x2a8] sm:$0xff] }
 0x1c0   : > { %1337 = vmatpush2.msra.mxu1 %v977_v61  ;;  %1261 = vmatprep.subr.mxu0 %v846_v63  ;;  %v1458_v59 = vld [vmem:[%s2986_s7 + $0x1e8] sm:$0xff]  ;;  %v1481_v61 = vld [vmem:[%s2986_s7 + $0x2a0] sm:$0xff] }
 0x1c1   : > { %1338 = vmatprep.subr.mxu1 %v974_v0  ;;  %1262 = vmatpush2.msra.mxu0 %v845_v1  ;;  %v1457_v63 = vld [vmem:[%s2986_s7 + $0x1e0] sm:$0xff]  ;;  %v1480_v0 = vld [vmem:[%s2986_s7 + $0x298] sm:$0xff] }
 0x1c2   : > { %1339 = vmatpush2.msra.mxu1 %v973_v2  ;;  %1263 = vmatprep.subr.mxu0 %v842_v6  ;;  %v1456_v1 = vld [vmem:[%s2986_s7 + $0x1d8] sm:$0xff]  ;;  %v1479_v2 = vld [vmem:[%s2986_s7 + $0x290] sm:$0xff] }
 0x1c3   : > { %1340 = vmatprep.subr.mxu1 %v970_v7  ;;  %1264 = vmatpush2.msra.mxu0 %v841_v9  ;;  %v1455_v6 = vld [vmem:[%s2986_s7 + $0x1d0] sm:$0xff]  ;;  %v1478_v7 = vld [vmem:[%s2986_s7 + $0x288] sm:$0xff] }
 0x1c4   : > { %1341 = vmatpush2.msra.mxu1 %v969_v10  ;;  %1265 = vmatprep.subr.mxu0 %v838_v11  ;;  %v1454_v9 = vld [vmem:[%s2986_s7 + $0x1c8] sm:$0xff]  ;;  %v1477_v10 = vld [vmem:[%s2986_s7 + $0x280] sm:$0xff] }
 0x1c5   : > { %1342 = vmatprep.subr.mxu1 %v966_v12  ;;  %1266 = vmatpush2.msra.mxu0 %v837_v13  ;;  %v1453_v11 = vld [vmem:[%s2986_s7 + $0x1c0] sm:$0xff]  ;;  %v1476_v12 = vld [vmem:[%s2986_s7 + $0x278] sm:$0xff] }
 0x1c6   : > { %1343 = vmatpush2.msra.mxu1 %v965_v14  ;;  %1268 = vmatmul.mubr.f32.vlgmr.msra.gmra.mxu0 %v2498_v36  ;;  %v1424_v36 = vld [vmem:[%s2986_s7 + $0xd8] sm:$0xff]  ;;  %v1475_v14 = vld [vmem:[%s2986_s7 + $0x270] sm:$0xff] }
 0x1c7   : > { %1345 = vmatmul.mubr.f32.vlgmr.msra.gmra.mxu1 %v2500_v42  ;;  %1273 = vmatprep.mubr.f32.mxu0 %v2504_v57  ;;  %v1423_v42 = vld [vmem:[%s2986_s7 + $0xd0] sm:$0xff]  ;;  %v1422_v57 = vld [vmem:[%s2986_s7 + $0xc8] sm:$0xff]  ;;  %v1452_v13 = vld [vmem:[%s2986_s7 + $0x1b8] sm:$0xff] }
 0x1c8   : > { %1350 = vmatprep.mubr.f32.mxu1 %v2506_v58  ;;  %1537 = vmatprep.subr.mxu0 %v1428_v15  ;;  %v1421_v58 = vld [vmem:[%s2986_s7 + $0xc0] sm:$0xff]  ;;  %v1451_v15 = vld [vmem:[%s2986_s7 + $0x1b0] sm:$0xff] }
 0x1c9   : > { %1538 = vmatpush1.msra.mxu0 %v1427_v16  ;;  %1614 = vmatprep.subr.mxu1 %v1492_v32  ;;  %v1474_v16 = vld [vmem:[%s2986_s7 + $0x268] sm:$0xff]  ;;  %v1461_v32 = vld [vmem:[%s2986_s7 + $0x200] sm:$0xff] }
 0x1ca   : > { %1274 = vmatmul.mubr.f32.gmra.mxu0 %v2508_v60  ;;  %1539 = vmatprep.subr.mxu0 %v1426_v17  ;;  %v1420_v60 = vld [vmem:[%s2986_s7 + $0xb8] sm:$0xff]  ;;  %v1450_v17 = vld [vmem:[%s2986_s7 + $0x1a8] sm:$0xff] }
 0x1cb   : > { %1351 = vmatmul.mubr.f32.gmra.mxu1 %v2510_v62  ;;  %1540 = vmatpush1.msra.mxu0 %v1425_v18  ;;  %v1419_v62 = vld [vmem:[%s2986_s7 + $0xb0] sm:$0xff]  ;;  %v1473_v18 = vld [vmem:[%s2986_s7 + $0x260] sm:$0xff] }
 0x1cc   : > { %1541 = vmatprep.subr.mxu0 %v1424_v36  ;;  %1615 = vmatpush1.msra.mxu1 %v1491_v33  ;;  %v1449_v36 = vld [vmem:[%s2986_s7 + $0x1a0] sm:$0xff] }
 0x1cd   : > { %1542 = vmatpush1.msra.mxu0 %v1423_v42  ;;  %1616 = vmatprep.subr.mxu1 %v1490_v34  ;;  %v1472_v42 = vld [vmem:[%s2986_s7 + $0x258] sm:$0xff]  ;;  %v1437_v33 = vld [vmem:[%s2986_s7 + $0x140] sm:$0xff] }
 0x1ce   : > { %1543 = vmatprep.subr.mxu0 %v1422_v57  ;;  %1617 = vmatpush1.msra.mxu1 %v1489_v35  ;;  %v1448_v57 = vld [vmem:[%s2986_s7 + $0x198] sm:$0xff] }
 0x1cf   : > { %1544 = vmatpush1.msra.mxu0 %v1421_v58  ;;  %1618 = vmatprep.subr.mxu1 %v1488_v38  ;;  %v1471_v58 = vld [vmem:[%s2986_s7 + $0x250] sm:$0xff]  ;;  %v1524_v34 = vld [vmem:[%s2986_s7 + $0x3f8] sm:$0xff] }
 0x1d0   : > { %1545 = vmatprep.subr.mxu0 %v1420_v60  ;;  %1619 = vmatpush1.msra.mxu1 %v1487_v40  ;;  %v1447_v60 = vld [vmem:[%s2986_s7 + $0x190] sm:$0xff]  ;;  %v1436_v35 = vld [vmem:[%s2986_s7 + $0x138] sm:$0xff]  ;;  %v1434_v40 = vld [vmem:[%s2986_s7 + $0x128] sm:$0xff] }
 0x1d1   : > { %1546 = vmatpush1.msra.mxu0 %v1419_v62  ;;  %1620 = vmatprep.subr.mxu1 %v1486_v43  ;;  %v1470_v62 = vld [vmem:[%s2986_s7 + $0x248] sm:$0xff]  ;;  %v1435_v38 = vld [vmem:[%s2986_s7 + $0x130] sm:$0xff]  ;;  %v1433_v43 = vld [vmem:[%s2986_s7 + $0x120] sm:$0xff] }
 0x1d2   : > { %1547 = vmatprep.subr.mxu0 %v1418_v19  ;;  %1621 = vmatpush1.msra.mxu1 %v1485_v45  ;;  %v1446_v19 = vld [vmem:[%s2986_s7 + $0x188] sm:$0xff]  ;;  %v1431_v45 = vld [vmem:[%s2986_s7 + $0x110] sm:$0xff] }
 0x1d3   : > { %1548 = vmatpush1.msra.mxu0 %v1417_v4  ;;  %1622 = vmatprep.subr.mxu1 %v1484_v47  ;;  %v1469_v4 = vld [vmem:[%s2986_s7 + $0x240] sm:$0xff] }
 0x1d4   : > { %1549 = vmatprep.subr.mxu0 %v1416_v20  ;;  %1623 = vmatpush1.msra.mxu1 %v1483_v54  ;;  %v1445_v20 = vld [vmem:[%s2986_s7 + $0x180] sm:$0xff]  ;;  %v1519_v54 = vld [vmem:[%s2986_s7 + $0x3d0] sm:$0xff] }
 0x1d5   : > { %1550 = vmatpush1.msra.mxu0 %v1415_v8  ;;  %1624 = vmatprep.subr.mxu1 %v1482_v56  ;;  %v1468_v8 = vld [vmem:[%s2986_s7 + $0x238] sm:$0xff]  ;;  %v1429_v47 = vld [vmem:[%s2986_s7 + $0x100] sm:$0xff] }
 0x1d6   : > { %1551 = vmatprep.subr.mxu0 %v1414_v21  ;;  %1625 = vmatpush1.msra.mxu1 %v1481_v61  ;;  %v1444_v21 = vld [vmem:[%s2986_s7 + $0x178] sm:$0xff]  ;;  %v1517_v56 = vld [vmem:[%s2986_s7 + $0x3c0] sm:$0xff]  ;;  %v1515_v61 = vld [vmem:[%s2986_s7 + $0x3b0] sm:$0xff] }
 0x1d7   : > { %1552 = vmatpush1.msra.mxu0 %v1413_v3  ;;  %1626 = vmatprep.subr.mxu1 %v1480_v0  ;;  %v1467_v3 = vld [vmem:[%s2986_s7 + $0x230] sm:$0xff]  ;;  %v1513_v0 = vld [vmem:[%s2986_s7 + $0x3a0] sm:$0xff] }
 0x1d8   : > { %1553 = vmatprep.subr.mxu0 %v1412_v22  ;;  %1627 = vmatpush1.msra.mxu1 %v1479_v2  ;;  %v1443_v22 = vld [vmem:[%s2986_s7 + $0x170] sm:$0xff] }
 0x1d9   : > { %1554 = vmatpush1.msra.mxu0 %v1411_v5  ;;  %1628 = vmatprep.subr.mxu1 %v1478_v7  ;;  %v1466_v5 = vld [vmem:[%s2986_s7 + $0x228] sm:$0xff]  ;;  %v1511_v2 = vld [vmem:[%s2986_s7 + $0x390] sm:$0xff]  ;;  %v1509_v7 = vld [vmem:[%s2986_s7 + $0x380] sm:$0xff] }
 0x1da   : > { %1555 = vmatprep.subr.mxu0 %v1410_v23  ;;  %1629 = vmatpush1.msra.mxu1 %v1477_v10  ;;  %v1442_v23 = vld [vmem:[%s2986_s7 + $0x168] sm:$0xff]  ;;  %v1507_v10 = vld [vmem:[%s2986_s7 + $0x370] sm:$0xff] }
 0x1db   : > { %1556 = vmatpush1.msra.mxu0 %v1409_v24  ;;  %1630 = vmatprep.subr.mxu1 %v1476_v12  ;;  %v1465_v24 = vld [vmem:[%s2986_s7 + $0x220] sm:$0xff] }
 0x1dc   : > { %1557 = vmatprep.subr.mxu0 %v1408_v25  ;;  %1631 = vmatpush1.msra.mxu1 %v1475_v14  ;;  %v1441_v25 = vld [vmem:[%s2986_s7 + $0x160] sm:$0xff]  ;;  %v1503_v14 = vld [vmem:[%s2986_s7 + $0x350] sm:$0xff] }
 0x1dd   : > { %1558 = vmatpush1.msra.mxu0 %v1407_v26  ;;  %1632 = vmatprep.subr.mxu1 %v1474_v16  ;;  %v1464_v26 = vld [vmem:[%s2986_s7 + $0x218] sm:$0xff]  ;;  %v1505_v12 = vld [vmem:[%s2986_s7 + $0x360] sm:$0xff] }
 0x1de   : > { %1559 = vmatprep.subr.mxu0 %v1406_v27  ;;  %1633 = vmatpush1.msra.mxu1 %v1473_v18  ;;  %v1440_v27 = vld [vmem:[%s2986_s7 + $0x158] sm:$0xff]  ;;  %v1501_v16 = vld [vmem:[%s2986_s7 + $0x340] sm:$0xff]  ;;  %v1499_v18 = vld [vmem:[%s2986_s7 + $0x330] sm:$0xff] }
 0x1df   : > { %1560 = vmatpush1.msra.mxu0 %v1405_v28  ;;  %1634 = vmatprep.subr.mxu1 %v1472_v42  ;;  %v1463_v28 = vld [vmem:[%s2986_s7 + $0x210] sm:$0xff]  ;;  %v1497_v42 = vld [vmem:[%s2986_s7 + $0x320] sm:$0xff] }
 0x1e0   : > { %1561 = vmatprep.subr.mxu0 %v1404_v29  ;;  %1635 = vmatpush1.msra.mxu1 %v1471_v58  ;;  %v1439_v29 = vld [vmem:[%s2986_s7 + $0x150] sm:$0xff] }
 0x1e1   : > { %1562 = vmatpush1.msra.mxu0 %v1403_v30  ;;  %1636 = vmatprep.subr.mxu1 %v1470_v62  ;;  %v1462_v30 = vld [vmem:[%s2986_s7 + $0x208] sm:$0xff]  ;;  %v1495_v58 = vld [vmem:[%s2986_s7 + $0x310] sm:$0xff]  ;;  %v1493_v62 = vld [vmem:[%s2986_s7 + $0x300] sm:$0xff] }
 0x1e2   : > { %1563 = vmatprep.subr.mxu0 %v1402_v31  ;;  %1637 = vmatpush1.msra.mxu1 %v1469_v4  ;;  %v1438_v31 = vld [vmem:[%s2986_s7 + $0x148] sm:$0xff] }
 0x1e3   : > { %1564 = vmatpush1.msra.mxu0 %v1401_v37  ;;  %1638 = vmatprep.subr.mxu1 %v1468_v8  ;;  %v1523_v37 = vld [vmem:[%s2986_s7 + $0x3f0] sm:$0xff] }
 0x1e4   : > { %1565 = vmatprep.subr.mxu0 %v1400_v39  ;;  %1639 = vmatpush1.msra.mxu1 %v1467_v3  ;;  %v1522_v39 = vld [vmem:[%s2986_s7 + $0x3e8] sm:$0xff] }
 0x1e5   : > { %1566 = vmatpush1.msra.mxu0 %v1399_v41  ;;  %1640 = vmatprep.subr.mxu1 %v1466_v5  ;;  %v1521_v41 = vld [vmem:[%s2986_s7 + $0x3e0] sm:$0xff] }
 0x1e6   : > { %1567 = vmatprep.subr.mxu0 %v1398_v44  ;;  %1641 = vmatpush1.msra.mxu1 %v1465_v24  ;;  %v1432_v44 = vld [vmem:[%s2986_s7 + $0x118] sm:$0xff] }
 0x1e7   : > { %1568 = vmatpush1.msra.mxu0 %v1397_v46  ;;  %1642 = vmatprep.subr.mxu1 %v1464_v26  ;;  %v1430_v46 = vld [vmem:[%s2986_s7 + $0x108] sm:$0xff] }
 0x1e8   : > { %1569 = vmatprep.subr.mxu0 %v1460_v51  ;;  %1643 = vmatpush1.msra.mxu1 %v1463_v28  ;;  %v1520_v51 = vld [vmem:[%s2986_s7 + $0x3d8] sm:$0xff] }
 0x1e9   : > { %1570 = vmatpush2.msra.mxu0 %v1459_v55  ;;  %1644 = vmatprep.subr.mxu1 %v1462_v30  ;;  %v1518_v55 = vld [vmem:[%s2986_s7 + $0x3c8] sm:$0xff] }
 0x1ea   : > { %1571 = vmatprep.subr.mxu0 %v1458_v59  ;;  %1645 = vmatpush1.msra.mxu1 %v1461_v32  ;;  %v1516_v59 = vld [vmem:[%s2986_s7 + $0x3b8] sm:$0xff] }
 0x1eb   : > { %1572 = vmatpush2.msra.mxu0 %v1457_v63  ;;  %1646 = vmatprep.subr.mxu1 %v1524_v34  ;;  %v1514_v63 = vld [vmem:[%s2986_s7 + $0x3a8] sm:$0xff] }
 0x1ec   : > { %1573 = vmatprep.subr.mxu0 %v1456_v1  ;;  %1647 = vmatpush2.msra.mxu1 %v1523_v37  ;;  %v1512_v1 = vld [vmem:[%s2986_s7 + $0x398] sm:$0xff] }
 0x1ed   : > { %1574 = vmatpush2.msra.mxu0 %v1455_v6  ;;  %1648 = vmatprep.subr.mxu1 %v1522_v39  ;;  %v1510_v6 = vld [vmem:[%s2986_s7 + $0x388] sm:$0xff] }
 0x1ee   : > { %1575 = vmatprep.subr.mxu0 %v1454_v9  ;;  %1649 = vmatpush2.msra.mxu1 %v1521_v41  ;;  %v1508_v9 = vld [vmem:[%s2986_s7 + $0x378] sm:$0xff] }
 0x1ef   : > { %1576 = vmatpush2.msra.mxu0 %v1453_v11  ;;  %1650 = vmatprep.subr.mxu1 %v1520_v51  ;;  %v1506_v11 = vld [vmem:[%s2986_s7 + $0x368] sm:$0xff] }
 0x1f0   : > { %1577 = vmatprep.subr.mxu0 %v1452_v13  ;;  %1651 = vmatpush2.msra.mxu1 %v1519_v54  ;;  %v1504_v13 = vld [vmem:[%s2986_s7 + $0x358] sm:$0xff] }
 0x1f1   : > { %1578 = vmatpush2.msra.mxu0 %v1451_v15  ;;  %1652 = vmatprep.subr.mxu1 %v1518_v55  ;;  %v1502_v15 = vld [vmem:[%s2986_s7 + $0x348] sm:$0xff] }
 0x1f2   : > { %1579 = vmatprep.subr.mxu0 %v1450_v17  ;;  %1653 = vmatpush2.msra.mxu1 %v1517_v56  ;;  %v1500_v17 = vld [vmem:[%s2986_s7 + $0x338] sm:$0xff] }
 0x1f3   : > { %1580 = vmatpush2.msra.mxu0 %v1449_v36  ;;  %1654 = vmatprep.subr.mxu1 %v1516_v59  ;;  %v1498_v36 = vld [vmem:[%s2986_s7 + $0x328] sm:$0xff] }
 0x1f4   : > { %1581 = vmatprep.subr.mxu0 %v1448_v57  ;;  %1655 = vmatpush2.msra.mxu1 %v1515_v61  ;;  %v1496_v57 = vld [vmem:[%s2986_s7 + $0x318] sm:$0xff] }
 0x1f5   : > { %1582 = vmatpush2.msra.mxu0 %v1447_v60  ;;  %1656 = vmatprep.subr.mxu1 %v1514_v63  ;;  %v1494_v60 = vld [vmem:[%s2986_s7 + $0x308] sm:$0xff] }
 0x1f6   : > { %1583 = vmatprep.subr.mxu0 %v1446_v19  ;;  %1657 = vmatpush2.msra.mxu1 %v1513_v0  ;;  %v1027_v19 = vld [vmem:[%s2985_s6] sm:$0xf] }
 0x1f7   : > { %1584 = vmatpush2.msra.mxu0 %v1445_v20  ;;  %1658 = vmatprep.subr.mxu1 %v1512_v1  ;;  %v1032_v4 = vrot.slane %v1027_v19, %v2482_v49  ;;  %v1036_v20 = vrot.slane %v1027_v19, %v2489_v52  ;;  %v1040_v1 = vrot.slane %v1027_v19, %v548_v50 }
 0x1f8   : > { %1585 = vmatprep.subr.mxu0 %v1444_v21  ;;  %1659 = vmatpush2.msra.mxu1 %v1511_v2  ;;  %v1044_v2 = vrot.slane %v1027_v19, %v552_v53 }
 0x1f9   : > { %1586 = vmatpush2.msra.mxu0 %v1443_v22  ;;  %1660 = vmatprep.subr.mxu1 %v1510_v6 }
 0x1fa   : > { %1587 = vmatprep.subr.mxu0 %v1442_v23  ;;  %1661 = vmatpush2.msra.mxu1 %v1509_v7 }
 0x1fb   : > { %1588 = vmatpush2.msra.mxu0 %v1441_v25  ;;  %1662 = vmatprep.subr.mxu1 %v1508_v9 }
 0x1fc   : > { %1589 = vmatprep.subr.mxu0 %v1440_v27  ;;  %1663 = vmatpush2.msra.mxu1 %v1507_v10 }
 0x1fd   : > { %1590 = vmatpush2.msra.mxu0 %v1439_v29  ;;  %1664 = vmatprep.subr.mxu1 %v1506_v11 }
 0x1fe   : > { %1591 = vmatprep.subr.mxu0 %v1438_v31  ;;  %1665 = vmatpush2.msra.mxu1 %v1505_v12 }
 0x1ff   : > { %1592 = vmatpush2.msra.mxu0 %v1437_v33  ;;  %1666 = vmatprep.subr.mxu1 %v1504_v13 }
 0x200   : > { %1593 = vmatprep.subr.mxu0 %v1436_v35  ;;  %1667 = vmatpush2.msra.mxu1 %v1503_v14 }
 0x201   : > { %1594 = vmatpush2.msra.mxu0 %v1435_v38  ;;  %1668 = vmatprep.subr.mxu1 %v1502_v15 }
 0x202   : > { %1595 = vmatprep.subr.mxu0 %v1434_v40  ;;  %1669 = vmatpush2.msra.mxu1 %v1501_v16 }
 0x203   : > { %1596 = vmatpush2.msra.mxu0 %v1433_v43  ;;  %1670 = vmatprep.subr.mxu1 %v1500_v17 }
 0x204   : > { %1597 = vmatprep.subr.mxu0 %v1432_v44  ;;  %1671 = vmatpush2.msra.mxu1 %v1499_v18 }
 0x205   : > { %1598 = vmatpush2.msra.mxu0 %v1431_v45  ;;  %1672 = vmatprep.subr.mxu1 %v1498_v36 }
 0x206   : > { %1599 = vmatprep.subr.mxu0 %v1430_v46  ;;  %1673 = vmatpush2.msra.mxu1 %v1497_v42 }
 0x207   : > { %1600 = vmatpush2.msra.mxu0 %v1429_v47  ;;  %1674 = vmatprep.subr.mxu1 %v1496_v57 }
 0x208   : > { %1675 = vmatpush2.msra.mxu1 %v1495_v58 }
 0x209   : > { %1676 = vmatprep.subr.mxu1 %v1494_v60 }
 0x20a   : > { %1677 = vmatpush2.msra.mxu1 %v1493_v62 }
 0x243   : > { %v1115_v8 = vpop.f32.mrf.mxu0 }
 0x244   : > { %v1116_v21 = vadd.f32 %v1115_v8, %v1032_v4  ;;  %v1192_v3 = vpop.f32.mrf.mxu1 }
 0x245   : > { %v1117_v22 = vpop.f32.mrf.mxu0 }
 0x246   : > { %v1193_v5 = vadd.f32 %v1192_v3, %v1116_v21  ;;  %v1118_v23 = vadd.f32 %v1117_v22, %v1036_v20  ;;  %v1194_v24 = vpop.f32.mrf.mxu1 }
 0x248   : > { %v1365_v25 = vmul.f32 0.70710677, %v1193_v5  ;;  %v1195_v26 = vadd.f32 %v1194_v24, %v1118_v23  ;;  %v1357_v45 = vmul.f32 0.5, %v1193_v5 }
 0x249   : > { %v1121_v27 = vpop.f32.mrf.mxu0 }
 0x24a   : > { %1888 = verf.f32 %v1365_v25  ;;  %v1366_v28 = vmul.f32 0.70710677, %v1195_v26  ;;  %v1122_v29 = vadd.f32 %v1121_v27, %v1032_v4  ;;  %v1198_v30 = vpop.f32.mrf.mxu1  ;;  %v1358_v43 = vmul.f32 0.5, %v1195_v26 }
 0x24b   : > { %v1123_v31 = vpop.f32.mrf.mxu0 }
 0x24c   : > { %1890 = verf.f32 %v1366_v28  ;;  %v1124_v32 = vadd.f32 %v1123_v31, %v1036_v20  ;;  %v1199_v33 = vadd.f32 %v1198_v30, %v1122_v29  ;;  %v1200_v34 = vpop.f32.mrf.mxu1  ;;  %v1525_v30 = vld [vmem:[%s2987_s8] sm:$0x3] }
 0x24e   : > { %v1369_v35 = vmul.f32 0.70710677, %v1199_v33  ;;  %v1201_v37 = vadd.f32 %v1200_v34, %v1124_v32  ;;  %v1361_v54 = vmul.f32 0.5, %v1199_v33  ;;  %v1530_v32 = vrot.slane %v1525_v30, %v2482_v49 }
 0x24f   : > { %v1534_v33 = vrot.slane %v1525_v30, %v2489_v52  ;;  %v1905_v52 = vld [vmem:[%s2313_s23 + $0x8] sm:$0xff] }
 0x250   : > { %1892 = verf.f32 %v1369_v35  ;;  %v1370_v38 = vmul.f32 0.70710677, %v1201_v37  ;;  %v1362_v55 = vmul.f32 0.5, %v1201_v37 }
 0x252   : > { %1894 = verf.f32 %v1370_v38 }
 0x257   : > { %v1889_v39 = vpop.eup %1888 }
 0x258   : > { %v1381_v41 = vadd.f32 1.0, %v1889_v39 }
 0x259   : > { %v1891_v40 = vpop.eup %1890 }
 0x25a   : > { %v1382_v44 = vadd.f32 1.0, %v1891_v40  ;;  %v1389_v51 = vmul.f32 %v1381_v41, %v1357_v45 }
 0x25c   : > { %v1390_v46 = vmul.f32 %v1382_v44, %v1358_v43  ;;  %v1904_v44 = vld [vmem:[%s2313_s23] sm:$0xff] }
 0x25d   : > { %v1893_v47 = vpop.eup %1892 }
 0x25e   : > { %1601 = vmatprep.mubr.f32.mxu0 %v1390_v46  ;;  %v1385_v56 = vadd.f32 1.0, %v1893_v47 }
 0x25f   : > { %v1895_v59 = vpop.eup %1894  ;;  %1602 = vmatmul.mubr.f32.vlgmr.msra.gmra.mxu0 %v1389_v51 }
 0x260   : > { %v1386_v61 = vadd.f32 1.0, %v1895_v59  ;;  %v1393_v63 = vmul.f32 %v1385_v56, %v1361_v54  ;;  %v1906_v59 = vld [vmem:[%s2313_s23 + $0x10] sm:$0xff] }
 0x262   : > { %v1394_v0 = vmul.f32 %v1386_v61, %v1362_v55 }
 0x264   : > { %1607 = vmatprep.mubr.f32.mxu0 %v1394_v0  ;;  %v1907_v0 = vld [vmem:[%s2313_s23 + $0x18] sm:$0xff] }
 0x265   : > { %1608 = vmatmul.mubr.f32.gmra.mxu0 %v1393_v63 }
 0x286   : > { %v1269_v6 = vpop.f32.mrf.mxu0 }
 0x287   : > { %v1270_v7 = vadd.f32 %v1269_v6, %v1040_v1  ;;  %v1346_v9 = vpop.f32.mrf.mxu1 }
 0x288   : > { %v1271_v10 = vpop.f32.mrf.mxu0 }
 0x289   : > { %v1347_v11 = vadd.f32 %v1346_v9, %v1270_v7  ;;  %v1272_v12 = vadd.f32 %v1271_v10, %v1044_v2  ;;  %v1348_v13 = vpop.f32.mrf.mxu1 }
 0x28a   : > { %v1275_v14 = vpop.f32.mrf.mxu0 }
 0x28b   : > { %v1367_v15 = vmul.f32 0.70710677, %v1347_v11  ;;  %v1349_v16 = vadd.f32 %v1348_v13, %v1272_v12  ;;  %v1276_v17 = vadd.f32 %v1275_v14, %v1040_v1  ;;  %v1352_v18 = vpop.f32.mrf.mxu1  ;;  %v1359_v3 = vmul.f32 0.5, %v1347_v11 }
 0x28c   : > { %v1277_v36 = vpop.f32.mrf.mxu0 }
 0x28d   : > { %1896 = verf.f32 %v1367_v15  ;;  %v1368_v42 = vmul.f32 0.70710677, %v1349_v16  ;;  %v1353_v57 = vadd.f32 %v1352_v18, %v1276_v17  ;;  %v1278_v50 = vadd.f32 %v1277_v36, %v1044_v2  ;;  %v1354_v53 = vpop.f32.mrf.mxu1 }
 0x28e   : > { %v1360_v20 = vmul.f32 0.5, %v1349_v16 }
 0x28f   : > { %1898 = verf.f32 %v1368_v42  ;;  %v1371_v48 = vmul.f32 0.70710677, %v1353_v57  ;;  %v1355_v58 = vadd.f32 %v1354_v53, %v1278_v50  ;;  %v1363_v27 = vmul.f32 0.5, %v1353_v57 }
 0x291   : > { %1900 = verf.f32 %v1371_v48  ;;  %v1372_v60 = vmul.f32 0.70710677, %v1355_v58  ;;  %v1364_v25 = vmul.f32 0.5, %v1355_v58 }
 0x293   : > { %1902 = verf.f32 %v1372_v60 }
 0x29a   : > { %v1897_v62 = vpop.eup %1896 }
 0x29b   : > { %v1383_v4 = vadd.f32 1.0, %v1897_v62 }
 0x29c   : > { %v1899_v19 = vpop.eup %1898 }
 0x29d   : > { %v1384_v8 = vadd.f32 1.0, %v1899_v19  ;;  %v1391_v5 = vmul.f32 %v1383_v4, %v1359_v3 }
 0x29e   : > { %v1901_v21 = vpop.eup %1900 }
 0x29f   : > { %v1392_v22 = vmul.f32 %v1384_v8, %v1360_v20  ;;  %v1387_v24 = vadd.f32 1.0, %v1901_v21 }
 0x2a0   : > { %v1903_v23 = vpop.eup %1902 }
 0x2a1   : > { %1678 = vmatprep.mubr.f32.mxu1 %v1392_v22  ;;  %v1388_v26 = vadd.f32 1.0, %v1903_v23  ;;  %v1395_v29 = vmul.f32 %v1387_v24, %v1363_v27 }
 0x2a2   : > { %1679 = vmatmul.mubr.f32.vlgmr.msra.gmra.mxu1 %v1391_v5 }
 0x2a3   : > { %v1396_v28 = vmul.f32 %v1388_v26, %v1364_v25 }
 0x2a5   : > { %1684 = vmatprep.mubr.f32.mxu1 %v1396_v28 }
 0x2a6   : > { %1685 = vmatmul.mubr.f32.gmra.mxu1 %v1395_v29 }
 0x31f   : > { %v1603_v31 = vpop.f32.mrf.mxu0 }
 0x320   : > { %v1604_v35 = vadd.f32 %v1603_v31, %v1530_v32 }
 0x321   : > { %v1605_v34 = vpop.f32.mrf.mxu0 }
 0x322   : > { %v1606_v39 = vadd.f32 %v1605_v34, %v1534_v33 }
 0x325   : > { %v1609_v37 = vpop.f32.mrf.mxu0 }
 0x326   : > { %v1610_v49 = vadd.f32 %v1609_v37, %v1530_v32 }
 0x327   : > { %v1611_v43 = vpop.f32.mrf.mxu0 }
 0x328   : > { %v1612_v54 = vadd.f32 %v1611_v43, %v1534_v33 }
 0x362   : > { %v1680_v38 = vpop.f32.mrf.mxu1 }
 0x363   : > { %v1681_v40 = vadd.f32 %v1680_v38, %v1604_v35 }
 0x364   : > { %v1682_v41 = vpop.f32.mrf.mxu1 }
 0x365   : > { %v1691_v45 = vadd.f32 %v1904_v44, %v1681_v40  ;;  %v1683_v46 = vadd.f32 %v1682_v41, %v1606_v39 }
 0x366   : > { %v1686_v51 = vpop.f32.mrf.mxu1 }
 0x367   : > { %1695 = vst [vmem:[%s340_s24] sm:$0xff] %v1691_v45  ;;  %v1692_v47 = vadd.f32 %v1905_v52, %v1683_v46  ;;  %v1687_v55 = vadd.f32 %v1686_v51, %v1610_v49 }
 0x368   : > { %v1688_v56 = vpop.f32.mrf.mxu1 }
 0x369   : > { %1696 = vst.msk [vmem:[%s340_s24 + $0x8] sm:$0xff] %vm357_vm0, %v1692_v47  ;;  %v1693_v61 = vadd.f32 %v1906_v59, %v1687_v55  ;;  %v1689_v63 = vadd.f32 %v1688_v56, %v1612_v54 }
 0x36b   : > { %1697 = vst [vmem:[%s340_s24 + $0x10] sm:$0xff] %v1693_v61  ;;  %v1694_v1 = vadd.f32 %v1907_v0, %v1689_v63 }
 0x36d   : > { %1698 = vst.msk [vmem:[%s340_s24 + $0x18] sm:$0xff] %vm357_vm0, %v1694_v1 }
 0x36e   : > { %1947 = shalt.err (!%p1944_p0)
}
 0x36f   : > { %s1948_s23 = scalar_lea.hbm %s2933_s29, 512  ;;  %s1952_s27 = scalar_lea.hbm %s2988_s9, 1024 }
 0x370   : > { %p1949_p1 = scmp.ne.s32.totalorder %s2933_s29, %s1948_s23  ;;  %p1953_p4 = scmp.lt.s32.totalorder %s2933_s29, %s2988_s9 }
 0x371   : > { %p1954_p7 = scmp.lt.s32.totalorder %s1952_s27, %s1948_s23 }
 0x372   : > { %p1950_p2 = pnand %p1949_p1, %p2095_p5 }
 0x373   : > { %p1955_p6 = por %p1954_p7, %p1953_p4 }
 0x374   : > { %p1951_p3 = pneg %p1950_p2 }
 0x376   : > { %p1956_p8 = pnand %p1955_p6, %p1951_p3 }
 0x378   : > { %1959 = shalt.err (!%p1956_p8)
}
 0x379   : > { %s2005_s16 = smov 256   ;;  %s2006_s14 = smov 16  }
 0x37a   : > { %1815 = dma.vmem_to_hbm [thread:$0]  (%p2095_p5), %s2928_s26, 512, %s2933_s29, %s2939_s13, %s2005_s16, %s2005_s16, %s2006_s14  }
 0x37b PF: > { %p1827_p9 = scmp.ge.s32.totalorder %s1998_s12, 2  ;;  %s1728_s17 = sand.u32 1, %s1986_s30  }
 0x37c   : > { %p2992_p10 = scmp.ne.s32.totalorder %s2990_s20, 0  ;;  %s1729_s21 = scalar_lea.sflag [#allocation4], %s1728_s17 }
 0x37e   : > { %p1822_p11 = pnand %p1827_p9, %p2992_p10 }
 0x380   : > { %p1823_p12 = pneg %p1822_p11 }
 0x382   : > { %1981 = dma.done.wait (%p1823_p12), %s1729_s21, 512  }
 0x383   : > { %1983 = vsyncadd (%p1823_p12), %s1729_s21, 4294966784  ;;  %p20_p13 = scmp.ge.s32.totalorder %s2082_s15, 4   ;;  %s2993_s30 = smov %s1990_s10 }
 0x384   : > { %s2994_s10 = smov %s1994_s11  ;;  %s2995_s11 = smov %s2093_s18 }
 0x385   : > { %s2996_s12 = smov %s2082_s15  ;;  %22 = sbr.rel (!%p20_p13) target bundleno = 4 (0x4), region = 96 }
 0x38a   :  { %1734 = vsyncpa [#allocation3], 1 }
 0x38b   :  { %1736 = vsyncpa [#allocation3 + $0x1], 1 }
 0x38c   :  { %1737 = vsyncpa [#allocation4], 1 }
 0x38d   :  { %1739 = vsyncpa [#allocation4 + $0x1], 1 }

</bundles_post_ra>
